<compile_context>
chip_gen: v7x
topology: tpu7x:2x2x1
jax: 0.10.0
libtpu: 0.0.40
codegen_flags: <defaults>
</compile_context>

<pallas_src>
import functools

import numpy as np

import jax
import jax.numpy as jnp
from jax.experimental import pallas as pl
from jax.experimental.pallas import tpu as pltpu


_LANES = 128
_VMEM_LIMIT = 32 * 1024 * 1024


# ---------------------------------------------------------------------------
# Bilinear (align_corners=True) interpolation matrix, PyTorch semantics.
# ---------------------------------------------------------------------------

def _interp_matrix(out_size, in_size):
    m = np.zeros((out_size, in_size), np.float32)
    for i in range(out_size):
        if out_size == 1 or in_size == 1:
            src = 0.0
        else:
            src = i * (in_size - 1) / (out_size - 1)
        lo = min(max(int(np.floor(src)), 0), in_size - 1)
        hi = min(lo + 1, in_size - 1)
        w_hi = float(src - lo)
        m[i, lo] += 1.0 - w_hi
        m[i, hi] += w_hi
    return m


# ---------------------------------------------------------------------------
# Layer-1 im2col pack (XLA side; only the tiny 3-channel input touches this).
# ---------------------------------------------------------------------------

def _im2col_parity_pack(x_nhwc):
    """3x3 / stride-2 / pad-1 patches with K=(kh,kw,c) on lanes (padded to 32).

    Rows are ordered (w-parity, h-parity, i, j) so conv1's matmul output lands
    directly in the parity-plane layout conv2 consumes inside the kernel."""
    n, h, w, _ = x_nhwc.shape
    h1, w1 = h // 2, w // 2                              # conv1 output spatial
    xp = jnp.pad(x_nhwc, ((0, 0), (1, 1), (1, 1), (0, 0)))
    taps = []
    for kh in range(3):
        for kw in range(3):
            taps.append(xp[:, kh:kh + 2 * h1:2, kw:kw + 2 * w1:2, :])
    patches = jnp.concatenate(taps, axis=-1)             # (n, h1, w1, 9*c)
    k = patches.shape[-1]
    p = patches.reshape(n, h1 // 2, 2, w1 // 2, 2, k)    # (n, i, hp, j, wp, k)
    p = jnp.transpose(p, (0, 4, 2, 1, 3, 5))             # (n, wp, hp, i, j, k)
    p = p.reshape(n, 4 * (h1 // 2) * (w1 // 2), k)
    k_pad = ((k + 7) // 8) * 8                           # 27 -> 32
    p = jnp.pad(p, ((0, 0), (0, 0), (0, k_pad - k)))
    return p.astype(jnp.bfloat16)


# ---------------------------------------------------------------------------
# Fused DeepLab kernel (one grid step per batch element).
# ---------------------------------------------------------------------------

def _deeplab_fused_kernel(x1_ref, w1_ref, b1_ref, w2_ref, b2_ref, wc_ref,
                          bc_ref, up_ref, feat_ref, pred_ref, f1s_ref,
                          *, h_feat, w_feat):
    m2 = h_feat * w_feat
    c1 = f1s_ref.shape[-1]
    c2 = w2_ref.shape[-1]

    # ---- conv1: one row-batched MXU matmul over the im2col'd input ---------
    y1 = jnp.dot(x1_ref[0], w1_ref[...], preferred_element_type=jnp.float32)
    y1 = jnp.maximum(y1 + b1_ref[...], 0.0)
    # planes q = wp*2 + hp, plane[q][i*w_feat + j] = y1[2i+hp, 2j+wp]
    f1s_ref[...] = y1.reshape(4, m2, c1)

    # ---- conv2 (3x3, stride 2, pad 1): nine row-batched tap matmuls --------
    A = f1s_ref[0]        # even row, even col
    B = f1s_ref[1]        # odd  row, even col
    C = f1s_ref[2]        # even row, odd  col
    D = f1s_ref[3]        # odd  row, odd  col

    rows = jax.lax.broadcasted_iota(jnp.int32, (m2, c1), 0)
    col_ok = (rows % w_feat) != 0      # wo == 0 reads the zero-padding column
    row_ok = rows >= w_feat            # ho == 0 reads the zero-padding row

    def shift(x, amount, ok):
        # +-1 spatial shift of a parity plane: XLU roll + VPU mask, no
        # offset/strided sublane loads.
        return jnp.where(ok, pltpu.roll(x, shift=amount, axis=0), 0.0)

    def tap(acc, kh, kw, lhs):
        return acc + jnp.dot(lhs.astype(jnp.bfloat16), w2_ref[kh * 3 + kw],
                             preferred_element_type=jnp.float32)

    acc = jnp.zeros((m2, c2), jnp.float32)
    acc = tap(acc, 1, 1, A)                            # y1[2ho  , 2wo  ]
    acc = tap(acc, 1, 2, C)                            # y1[2ho  , 2wo+1]
    acc = tap(acc, 2, 1, B)                            # y1[2ho+1, 2wo  ]
    acc = tap(acc, 2, 2, D)                            # y1[2ho+1, 2wo+1]
    Cs = shift(C, 1, col_ok)
    acc = tap(acc, 1, 0, Cs)                           # y1[2ho  , 2wo-1]
    Ds = shift(D, 1, col_ok)
    acc = tap(acc, 2, 0, Ds)                           # y1[2ho+1, 2wo-1]
    acc = tap(acc, 0, 1, shift(B, w_feat, row_ok))     # y1[2ho-1, 2wo  ]
    acc = tap(acc, 0, 2, shift(D, w_feat, row_ok))     # y1[2ho-1, 2wo+1]
    acc = tap(acc, 0, 0, shift(Ds, w_feat, row_ok))    # y1[2ho-1, 2wo-1]

    f2 = jnp.maximum(acc + b2_ref[...], 0.0)           # (m2, c2) f32
    feat_ref[0] = f2.astype(feat_ref.dtype)

    # ---- fused 1x1 cls head on the whole feature slab ----------------------
    logits = jnp.dot(f2.astype(jnp.bfloat16), wc_ref[...],
                     preferred_element_type=jnp.float32) + bc_ref[...]

    # ---- bilinear upsample (align_corners=True) as one MXU matmul ----------
    pred = jnp.dot(up_ref[...], logits, preferred_element_type=jnp.float32)
    pred_ref[0] = pred.astype(pred_ref.dtype)


def _deeplab_pallas(x1, w1k, b1, w2k, b2, wc, bc, up, *, h_feat, w_feat,
                    h_out, w_out):
    n, m1, k1 = x1.shape
    c1 = w1k.shape[-1]
    c2 = w2k.shape[-1]
    n_cls_pad = wc.shape[-1]
    m2 = h_feat * w_feat
    m_out = h_out * w_out
    kernel = functools.partial(_deeplab_fused_kernel,
                               h_feat=h_feat, w_feat=w_feat)
    return pl.pallas_call(
        kernel,
        out_shape=(jax.ShapeDtypeStruct((n, m2, c2), jnp.bfloat16),
                   jax.ShapeDtypeStruct((n, m_out, n_cls_pad), jnp.bfloat16)),
        grid=(n,),
        in_specs=[
            pl.BlockSpec((1, m1, k1), lambda i: (i, 0, 0)),        # im2col x
            pl.BlockSpec((k1, c1), lambda i: (0, 0)),              # w1
            pl.BlockSpec((1, c1), lambda i: (0, 0)),               # b1
            pl.BlockSpec((9, c1, c2), lambda i: (0, 0, 0)),        # w2
            pl.BlockSpec((1, c2), lambda i: (0, 0)),               # b2
            pl.BlockSpec((c2, n_cls_pad), lambda i: (0, 0)),       # wc
            pl.BlockSpec((1, n_cls_pad), lambda i: (0, 0)),        # bc
            pl.BlockSpec((m_out, m2), lambda i: (0, 0)),           # kron(rh,rw)
        ],
        out_specs=(
            pl.BlockSpec((1, m2, c2), lambda i: (i, 0, 0)),        # backbone
            pl.BlockSpec((1, m_out, n_cls_pad), lambda i: (i, 0, 0)),  # pred
        ),
        scratch_shapes=[pltpu.VMEM((4, m2, c1), jnp.float32)],     # f1 planes
        compiler_params=pltpu.CompilerParams(
            dimension_semantics=("parallel",),
            vmem_limit_bytes=_VMEM_LIMIT),
    )(x1, w1k, b1, w2k, b2, wc, bc, up)


# ---------------------------------------------------------------------------
# DeepLab model: params + forward.
# ---------------------------------------------------------------------------

def init_deeplab_params(key, in_channels=3, c1=128, out_channels=128,
                        num_classes=19):
    k1, k2, k3 = jax.random.split(key, 3)

    def he(k, shape):
        fan_in = shape[0] * shape[1] * shape[2]
        return jax.random.normal(k, shape, jnp.float32) * np.sqrt(2.0 / fan_in)

    n_cls_pad = ((num_classes + _LANES - 1) // _LANES) * _LANES
    # cls head init matches the torch module: normal(0, 0.01) weight, 0 bias.
    wc = jax.random.normal(k3, (out_channels, num_classes), jnp.float32) * 0.01
    wc = jnp.pad(wc, ((0, 0), (0, n_cls_pad - num_classes)))   # lane padding
    return {
        "w1": he(k1, (3, 3, in_channels, c1)).astype(jnp.bfloat16),
        "b1": jnp.zeros((1, c1), jnp.float32),
        "w2": he(k2, (3, 3, c1, out_channels)).astype(jnp.bfloat16),
        "b2": jnp.zeros((1, out_channels), jnp.float32),
        "wc": wc.astype(jnp.bfloat16),
        "bc": jnp.zeros((1, n_cls_pad), jnp.float32),
    }


@functools.partial(jax.jit, static_argnames=("num_classes",))
def deeplab_forward(params, img, num_classes=19):
    """img: NCHW float32 -> {'backbone': NCHW features, 'pred': NCHW logits}."""
    n, _, h, w = img.shape
    assert h % 4 == 0 and w % 4 == 0, "spatial dims must be divisible by 4"
    h_feat, w_feat = h // 4, w // 4

    x = jnp.transpose(img, (0, 2, 3, 1))                        # NCHW->NHWC once
    x1 = _im2col_parity_pack(x.astype(jnp.bfloat16))            # (n, 4*m2, 32)

    k_in = (params["w1"].shape[0] * params["w1"].shape[1]
            * params["w1"].shape[2])                             # 27
    w1k = params["w1"].reshape(k_in, -1)
    w1k = jnp.pad(w1k, ((0, x1.shape[-1] - k_in), (0, 0)))       # K pad 27->32
    w2k = params["w2"].reshape(9, params["w2"].shape[2], params["w2"].shape[3])

    # NOTE: kron(rh, rw) is only ~256 KB at this size; at large resolutions
    # keep the upsample separable instead.
    rh = _interp_matrix(h, h_feat)
    rw = _interp_matrix(w, w_feat)
    up = jnp.asarray(np.kron(rh, rw), jnp.float32)               # (h*w, m2)

    feat, pred = _deeplab_pallas(
        x1, w1k, params["b1"], w2k, params["b2"], params["wc"], params["bc"],
        up, h_feat=h_feat, w_feat=w_feat, h_out=h, w_out=w)

    c2 = feat.shape[-1]
    feat = feat.reshape(n, h_feat, w_feat, c2)
    pred = pred.reshape(n, h, w, -1)[..., :num_classes]
    return {                                                     # NHWC->NCHW once
        "backbone": jnp.transpose(feat.astype(jnp.float32), (0, 3, 1, 2)),
        "pred": jnp.transpose(pred.astype(jnp.float32), (0, 3, 1, 2)),
    }


# ---------------------------------------------------------------------------
# Pure-XLA reference (same bf16 roundings of operands) for a smoke check.
# ---------------------------------------------------------------------------

def _reference_forward(params, img, num_classes=19):
    f32 = jnp.float32
    hi = jax.lax.Precision.HIGHEST
    x = jnp.transpose(img, (0, 2, 3, 1)).astype(jnp.bfloat16).astype(f32)

    def conv_s2(v, w, b):
        y = jax.lax.conv_general_dilated(
            v, w.astype(f32), (2, 2), ((1, 1), (1, 1)),
            dimension_numbers=("NHWC", "HWIO", "NHWC"), precision=hi)
        return jnp.maximum(y + b.reshape(1, 1, 1, -1), 0.0)

    f1 = conv_s2(x, params["w1"], params["b1"]).astype(jnp.bfloat16).astype(f32)
    f2 = conv_s2(f1, params["w2"], params["b2"])
    f2b = f2.astype(jnp.bfloat16).astype(f32)
    logits = jnp.einsum("nhwc,cd->nhwd", f2b, params["wc"].astype(f32),
                        precision=hi) + params["bc"].reshape(1, 1, 1, -1)
    h_out, w_out = img.shape[2], img.shape[3]
    rh = jnp.asarray(_interp_matrix(h_out, f2.shape[1]), f32)
    rw = jnp.asarray(_interp_matrix(w_out, f2.shape[2]), f32)
    up = jnp.einsum("Ww,nhwc->nhWc", rw, logits, precision=hi)
    up = jnp.einsum("Ih,nhWc->nIWc", rh, up, precision=hi)
    return {
        "backbone": jnp.transpose(f2, (0, 3, 1, 2)),
        "pred": jnp.transpose(up[..., :num_classes], (0, 3, 1, 2)),
    }


if __name__ == "__main__":
    key = jax.random.PRNGKey(0)
    k_param, k_img = jax.random.split(key)

    num_classes = 19
    params = init_deeplab_params(k_param, in_channels=3, c1=128,
                                 out_channels=128, num_classes=num_classes)
    img = jax.random.normal(k_img, (2, 3, 32, 32), jnp.float32)

    out = deeplab_forward(params, img, num_classes=num_classes)
    out = jax.block_until_ready(out)

    assert out["backbone"].shape == (2, 128, 8, 8)
    assert out["pred"].shape == (2, num_classes, 32, 32)

    ref = _reference_forward(params, img, num_classes=num_classes)
    for name in ("backbone", "pred"):
        np.testing.assert_allclose(np.asarray(out[name], np.float32),
                                   np.asarray(ref[name], np.float32),
                                   rtol=2e-2, atol=2e-3)

    print("KERNEL_OK")
</pallas_src>

<mosaic_0001>
module attributes {stable_mosaic.version = 11 : i64} {
  func.func @_deeplab_fused_kernel(%arg0: i32, %arg1: memref<1x256x32xbf16, #tpu.memory_space<vmem>>, %arg2: memref<32x128xbf16, #tpu.memory_space<vmem>>, %arg3: memref<1x128xf32, #tpu.memory_space<vmem>>, %arg4: memref<9x128x128xbf16, #tpu.memory_space<vmem>>, %arg5: memref<1x128xf32, #tpu.memory_space<vmem>>, %arg6: memref<128x128xbf16, #tpu.memory_space<vmem>>, %arg7: memref<1x128xf32, #tpu.memory_space<vmem>>, %arg8: memref<1024x64xf32, #tpu.memory_space<vmem>>, %arg9: memref<1x64x128xbf16, #tpu.memory_space<vmem>>, %arg10: memref<1x1024x128xbf16, #tpu.memory_space<vmem>>, %arg11: memref<4x64x128xf32, #tpu.memory_space<vmem>>) attributes {dimension_semantics = [#tpu.dimension_semantics<parallel>], iteration_bounds = array<i64: 2>, scalar_prefetch = 0 : i64, scratch_operands = 1 : i64, tpu.core_type = #tpu.core_type<tc>, window_params = [{transform_indices = @transform_0, window_bounds = array<i64: 1, 256, 32>}, {pipeline_mode = #tpu.pipeline_mode<synchronous>, transform_indices = @transform_1, window_bounds = array<i64: 32, 128>}, {pipeline_mode = #tpu.pipeline_mode<synchronous>, transform_indices = @transform_2, window_bounds = array<i64: 1, 128>}, {pipeline_mode = #tpu.pipeline_mode<synchronous>, transform_indices = @transform_3, window_bounds = array<i64: 9, 128, 128>}, {pipeline_mode = #tpu.pipeline_mode<synchronous>, transform_indices = @transform_4, window_bounds = array<i64: 1, 128>}, {pipeline_mode = #tpu.pipeline_mode<synchronous>, transform_indices = @transform_5, window_bounds = array<i64: 128, 128>}, {pipeline_mode = #tpu.pipeline_mode<synchronous>, transform_indices = @transform_6, window_bounds = array<i64: 1, 128>}, {pipeline_mode = #tpu.pipeline_mode<synchronous>, transform_indices = @transform_7, window_bounds = array<i64: 1024, 64>}, {transform_indices = @transform_8, window_bounds = array<i64: 1, 64, 128>}, {transform_indices = @transform_9, window_bounds = array<i64: 1, 1024, 128>}]} {
    %c0 = arith.constant 0 : index
    %c0_0 = arith.constant 0 : index
    %c0_1 = arith.constant 0 : index
    %0 = vector.load %arg1[%c0, %c0_0, %c0_1] : memref<1x256x32xbf16, #tpu.memory_space<vmem>>, vector<1x256x32xbf16>
    %1 = vector.shape_cast %0 : vector<1x256x32xbf16> to vector<256x32xbf16>
    %c0_2 = arith.constant 0 : index
    %c0_3 = arith.constant 0 : index
    %2 = vector.load %arg2[%c0_2, %c0_3] : memref<32x128xbf16, #tpu.memory_space<vmem>>, vector<32x128xbf16>
    %cst = arith.constant dense<0.000000e+00> : vector<256x128xf32>
    %3 = tpu.matmul %1, %2, %cst {dimension_numbers = #tpu.dot_dimension_numbers<[1], [0], [0], [1], [0, 0, 1, 1], [], []>} : vector<256x32xbf16>, vector<32x128xbf16>, vector<256x128xf32> -> vector<256x128xf32>
    %c0_4 = arith.constant 0 : index
    %c0_5 = arith.constant 0 : index
    %4 = vector.load %arg3[%c0_4, %c0_5] : memref<1x128xf32, #tpu.memory_space<vmem>>, vector<1x128xf32>
    %5 = vector.broadcast %4 : vector<1x128xf32> to vector<256x128xf32>
    %6 = arith.addf %3, %5 : vector<256x128xf32>
    %cst_6 = arith.constant 0.000000e+00 : f32
    %7 = vector.broadcast %cst_6 : f32 to vector<256x128xf32>
    %8 = arith.maximumf %6, %7 : vector<256x128xf32>
    %9 = vector.shape_cast %8 : vector<256x128xf32> to vector<4x64x128xf32>
    %c0_7 = arith.constant 0 : index
    %c0_8 = arith.constant 0 : index
    %c0_9 = arith.constant 0 : index
    %10 = vector.load %arg11[%c0_7, %c0_8, %c0_9] : memref<4x64x128xf32, #tpu.memory_space<vmem>>, vector<4x64x128xf32>
    tpu.vector_store %arg11[%c0_7, %c0_8, %c0_9], %9 {strides = array<i32>} : memref<4x64x128xf32, #tpu.memory_space<vmem>>, vector<4x64x128xf32>,
    %c0_10 = arith.constant 0 : index
    %c0_11 = arith.constant 0 : index
    %c0_12 = arith.constant 0 : index
    %11 = vector.load %arg11[%c0_10, %c0_11, %c0_12] : memref<4x64x128xf32, #tpu.memory_space<vmem>>, vector<1x64x128xf32>
    %12 = vector.shape_cast %11 : vector<1x64x128xf32> to vector<64x128xf32>
    %c1 = arith.constant 1 : index
    %c0_13 = arith.constant 0 : index
    %c0_14 = arith.constant 0 : index
    %13 = vector.load %arg11[%c1, %c0_13, %c0_14] : memref<4x64x128xf32, #tpu.memory_space<vmem>>, vector<1x64x128xf32>
    %14 = vector.shape_cast %13 : vector<1x64x128xf32> to vector<64x128xf32>
    %c2 = arith.constant 2 : index
    %c0_15 = arith.constant 0 : index
    %c0_16 = arith.constant 0 : index
    %15 = vector.load %arg11[%c2, %c0_15, %c0_16] : memref<4x64x128xf32, #tpu.memory_space<vmem>>, vector<1x64x128xf32>
    %16 = vector.shape_cast %15 : vector<1x64x128xf32> to vector<64x128xf32>
    %c3 = arith.constant 3 : index
    %c0_17 = arith.constant 0 : index
    %c0_18 = arith.constant 0 : index
    %17 = vector.load %arg11[%c3, %c0_17, %c0_18] : memref<4x64x128xf32, #tpu.memory_space<vmem>>, vector<1x64x128xf32>
    %18 = vector.shape_cast %17 : vector<1x64x128xf32> to vector<64x128xf32>
    %19 = tpu.iota {dimensions = array<i32: 0>} : vector<64x128xi32>
    %c8_i32 = arith.constant 8 : i32
    %c0_i32 = arith.constant 0 : i32
    %20 = arith.cmpi eq, %c8_i32, %c0_i32 : i32
    %c1_i32 = arith.constant 1 : i32
    %21 = arith.select %20, %c1_i32, %c8_i32 : i32
    %22 = vector.broadcast %21 : i32 to vector<64x128xi32>
    %23 = arith.remsi %19, %22 : vector<64x128xi32>
    %c0_i32_19 = arith.constant 0 : i32
    %24 = vector.broadcast %c0_i32_19 : i32 to vector<64x128xi32>
    %25 = arith.cmpi ne, %23, %24 : vector<64x128xi32>
    %c0_i32_20 = arith.constant 0 : i32
    %26 = vector.broadcast %c0_i32_20 : i32 to vector<64x128xi32>
    %27 = arith.cmpi slt, %23, %26 : vector<64x128xi32>
    %c0_i32_21 = arith.constant 0 : i32
    %28 = arith.cmpi slt, %21, %c0_i32_21 : i32
    %29 = vector.broadcast %28 : i1 to vector<64x128xi1>
    %30 = vector.broadcast %29 : vector<64x128xi1> to vector<64x128xi1>
    %31 = arith.xori %27, %30 : vector<64x128xi1>
    %32 = arith.andi %31, %25 : vector<64x128xi1>
    %33 = vector.broadcast %21 : i32 to vector<64x128xi32>
    %34 = arith.addi %23, %33 : vector<64x128xi32>
    %35 = arith.select %32, %34, %23 : vector<64x128xi1>, vector<64x128xi32>
    %c0_i32_22 = arith.constant 0 : i32
    %36 = vector.broadcast %c0_i32_22 : i32 to vector<64x128xi32>
    %37 = arith.cmpi ne, %35, %36 : vector<64x128xi32>
    %c8_i32_23 = arith.constant 8 : i32
    %38 = vector.broadcast %c8_i32_23 : i32 to vector<64x128xi32>
    %39 = arith.cmpi sge, %19, %38 : vector<64x128xi32>
    %cst_24 = arith.constant 0.000000e+00 : f32
    %40 = vector.broadcast %cst_24 : f32 to vector<64x128xf32>
    %41 = arith.truncf %12 : vector<64x128xf32> to vector<64x128xbf16>
    %c4 = arith.constant 4 : index
    %c0_25 = arith.constant 0 : index
    %c0_26 = arith.constant 0 : index
    %42 = vector.load %arg4[%c4, %c0_25, %c0_26] : memref<9x128x128xbf16, #tpu.memory_space<vmem>>, vector<1x128x128xbf16>
    %43 = vector.shape_cast %42 : vector<1x128x128xbf16> to vector<128x128xbf16>
    %cst_27 = arith.constant dense<0.000000e+00> : vector<64x128xf32>
    %44 = tpu.matmul %41, %43, %cst_27 {dimension_numbers = #tpu.dot_dimension_numbers<[1], [0], [0], [1], [0, 0, 1, 1], [], []>} : vector<64x128xbf16>, vector<128x128xbf16>, vector<64x128xf32> -> vector<64x128xf32>
    %45 = arith.addf %40, %44 : vector<64x128xf32>
    %46 = arith.truncf %16 : vector<64x128xf32> to vector<64x128xbf16>
    %c5 = arith.constant 5 : index
    %c0_28 = arith.constant 0 : index
    %c0_29 = arith.constant 0 : index
    %47 = vector.load %arg4[%c5, %c0_28, %c0_29] : memref<9x128x128xbf16, #tpu.memory_space<vmem>>, vector<1x128x128xbf16>
    %48 = vector.shape_cast %47 : vector<1x128x128xbf16> to vector<128x128xbf16>
    %cst_30 = arith.constant dense<0.000000e+00> : vector<64x128xf32>
    %49 = tpu.matmul %46, %48, %cst_30 {dimension_numbers = #tpu.dot_dimension_numbers<[1], [0], [0], [1], [0, 0, 1, 1], [], []>} : vector<64x128xbf16>, vector<128x128xbf16>, vector<64x128xf32> -> vector<64x128xf32>
    %50 = arith.addf %45, %49 : vector<64x128xf32>
    %51 = arith.truncf %14 : vector<64x128xf32> to vector<64x128xbf16>
    %c7 = arith.constant 7 : index
    %c0_31 = arith.constant 0 : index
    %c0_32 = arith.constant 0 : index
    %52 = vector.load %arg4[%c7, %c0_31, %c0_32] : memref<9x128x128xbf16, #tpu.memory_space<vmem>>, vector<1x128x128xbf16>
    %53 = vector.shape_cast %52 : vector<1x128x128xbf16> to vector<128x128xbf16>
    %cst_33 = arith.constant dense<0.000000e+00> : vector<64x128xf32>
    %54 = tpu.matmul %51, %53, %cst_33 {dimension_numbers = #tpu.dot_dimension_numbers<[1], [0], [0], [1], [0, 0, 1, 1], [], []>} : vector<64x128xbf16>, vector<128x128xbf16>, vector<64x128xf32> -> vector<64x128xf32>
    %55 = arith.addf %50, %54 : vector<64x128xf32>
    %56 = arith.truncf %18 : vector<64x128xf32> to vector<64x128xbf16>
    %c8 = arith.constant 8 : index
    %c0_34 = arith.constant 0 : index
    %c0_35 = arith.constant 0 : index
    %57 = vector.load %arg4[%c8, %c0_34, %c0_35] : memref<9x128x128xbf16, #tpu.memory_space<vmem>>, vector<1x128x128xbf16>
    %58 = vector.shape_cast %57 : vector<1x128x128xbf16> to vector<128x128xbf16>
    %cst_36 = arith.constant dense<0.000000e+00> : vector<64x128xf32>
    %59 = tpu.matmul %56, %58, %cst_36 {dimension_numbers = #tpu.dot_dimension_numbers<[1], [0], [0], [1], [0, 0, 1, 1], [], []>} : vector<64x128xbf16>, vector<128x128xbf16>, vector<64x128xf32> -> vector<64x128xf32>
    %60 = arith.addf %55, %59 : vector<64x128xf32>
    %c1_i32_37 = arith.constant 1 : i32
    %61 = tpu.dynamic_rotate %16 by %c1_i32_37 dim 0 : vector<64x128xf32>, i32 -> vector<64x128xf32>
    %cst_38 = arith.constant 0.000000e+00 : f32
    %62 = vector.broadcast %cst_38 : f32 to vector<64x128xf32>
    %63 = arith.select %37, %61, %62 : vector<64x128xi1>, vector<64x128xf32>
    %64 = arith.truncf %63 : vector<64x128xf32> to vector<64x128xbf16>
    %c3_39 = arith.constant 3 : index
    %c0_40 = arith.constant 0 : index
    %c0_41 = arith.constant 0 : index
    %65 = vector.load %arg4[%c3_39, %c0_40, %c0_41] : memref<9x128x128xbf16, #tpu.memory_space<vmem>>, vector<1x128x128xbf16>
    %66 = vector.shape_cast %65 : vector<1x128x128xbf16> to vector<128x128xbf16>
    %cst_42 = arith.constant dense<0.000000e+00> : vector<64x128xf32>
    %67 = tpu.matmul %64, %66, %cst_42 {dimension_numbers = #tpu.dot_dimension_numbers<[1], [0], [0], [1], [0, 0, 1, 1], [], []>} : vector<64x128xbf16>, vector<128x128xbf16>, vector<64x128xf32> -> vector<64x128xf32>
    %68 = arith.addf %60, %67 : vector<64x128xf32>
    %c1_i32_43 = arith.constant 1 : i32
    %69 = tpu.dynamic_rotate %18 by %c1_i32_43 dim 0 : vector<64x128xf32>, i32 -> vector<64x128xf32>
    %cst_44 = arith.constant 0.000000e+00 : f32
    %70 = vector.broadcast %cst_44 : f32 to vector<64x128xf32>
    %71 = arith.select %37, %69, %70 : vector<64x128xi1>, vector<64x128xf32>
    %72 = arith.truncf %71 : vector<64x128xf32> to vector<64x128xbf16>
    %c6 = arith.constant 6 : index
    %c0_45 = arith.constant 0 : index
    %c0_46 = arith.constant 0 : index
    %73 = vector.load %arg4[%c6, %c0_45, %c0_46] : memref<9x128x128xbf16, #tpu.memory_space<vmem>>, vector<1x128x128xbf16>
    %74 = vector.shape_cast %73 : vector<1x128x128xbf16> to vector<128x128xbf16>
    %cst_47 = arith.constant dense<0.000000e+00> : vector<64x128xf32>
    %75 = tpu.matmul %72, %74, %cst_47 {dimension_numbers = #tpu.dot_dimension_numbers<[1], [0], [0], [1], [0, 0, 1, 1], [], []>} : vector<64x128xbf16>, vector<128x128xbf16>, vector<64x128xf32> -> vector<64x128xf32>
    %76 = arith.addf %68, %75 : vector<64x128xf32>
    %c8_i32_48 = arith.constant 8 : i32
    %77 = tpu.dynamic_rotate %14 by %c8_i32_48 dim 0 : vector<64x128xf32>, i32 -> vector<64x128xf32>
    %cst_49 = arith.constant 0.000000e+00 : f32
    %78 = vector.broadcast %cst_49 : f32 to vector<64x128xf32>
    %79 = arith.select %39, %77, %78 : vector<64x128xi1>, vector<64x128xf32>
    %80 = arith.truncf %79 : vector<64x128xf32> to vector<64x128xbf16>
    %c1_50 = arith.constant 1 : index
    %c0_51 = arith.constant 0 : index
    %c0_52 = arith.constant 0 : index
    %81 = vector.load %arg4[%c1_50, %c0_51, %c0_52] : memref<9x128x128xbf16, #tpu.memory_space<vmem>>, vector<1x128x128xbf16>
    %82 = vector.shape_cast %81 : vector<1x128x128xbf16> to vector<128x128xbf16>
    %cst_53 = arith.constant dense<0.000000e+00> : vector<64x128xf32>
    %83 = tpu.matmul %80, %82, %cst_53 {dimension_numbers = #tpu.dot_dimension_numbers<[1], [0], [0], [1], [0, 0, 1, 1], [], []>} : vector<64x128xbf16>, vector<128x128xbf16>, vector<64x128xf32> -> vector<64x128xf32>
    %84 = arith.addf %76, %83 : vector<64x128xf32>
    %c8_i32_54 = arith.constant 8 : i32
    %85 = tpu.dynamic_rotate %18 by %c8_i32_54 dim 0 : vector<64x128xf32>, i32 -> vector<64x128xf32>
    %cst_55 = arith.constant 0.000000e+00 : f32
    %86 = vector.broadcast %cst_55 : f32 to vector<64x128xf32>
    %87 = arith.select %39, %85, %86 : vector<64x128xi1>, vector<64x128xf32>
    %88 = arith.truncf %87 : vector<64x128xf32> to vector<64x128xbf16>
    %c2_56 = arith.constant 2 : index
    %c0_57 = arith.constant 0 : index
    %c0_58 = arith.constant 0 : index
    %89 = vector.load %arg4[%c2_56, %c0_57, %c0_58] : memref<9x128x128xbf16, #tpu.memory_space<vmem>>, vector<1x128x128xbf16>
    %90 = vector.shape_cast %89 : vector<1x128x128xbf16> to vector<128x128xbf16>
    %cst_59 = arith.constant dense<0.000000e+00> : vector<64x128xf32>
    %91 = tpu.matmul %88, %90, %cst_59 {dimension_numbers = #tpu.dot_dimension_numbers<[1], [0], [0], [1], [0, 0, 1, 1], [], []>} : vector<64x128xbf16>, vector<128x128xbf16>, vector<64x128xf32> -> vector<64x128xf32>
    %92 = arith.addf %84, %91 : vector<64x128xf32>
    %c8_i32_60 = arith.constant 8 : i32
    %93 = tpu.dynamic_rotate %71 by %c8_i32_60 dim 0 : vector<64x128xf32>, i32 -> vector<64x128xf32>
    %cst_61 = arith.constant 0.000000e+00 : f32
    %94 = vector.broadcast %cst_61 : f32 to vector<64x128xf32>
    %95 = arith.select %39, %93, %94 : vector<64x128xi1>, vector<64x128xf32>
    %96 = arith.truncf %95 : vector<64x128xf32> to vector<64x128xbf16>
    %c0_62 = arith.constant 0 : index
    %c0_63 = arith.constant 0 : index
    %c0_64 = arith.constant 0 : index
    %97 = vector.load %arg4[%c0_62, %c0_63, %c0_64] : memref<9x128x128xbf16, #tpu.memory_space<vmem>>, vector<1x128x128xbf16>
    %98 = vector.shape_cast %97 : vector<1x128x128xbf16> to vector<128x128xbf16>
    %cst_65 = arith.constant dense<0.000000e+00> : vector<64x128xf32>
    %99 = tpu.matmul %96, %98, %cst_65 {dimension_numbers = #tpu.dot_dimension_numbers<[1], [0], [0], [1], [0, 0, 1, 1], [], []>} : vector<64x128xbf16>, vector<128x128xbf16>, vector<64x128xf32> -> vector<64x128xf32>
    %100 = arith.addf %92, %99 : vector<64x128xf32>
    %c0_66 = arith.constant 0 : index
    %c0_67 = arith.constant 0 : index
    %101 = vector.load %arg5[%c0_66, %c0_67] : memref<1x128xf32, #tpu.memory_space<vmem>>, vector<1x128xf32>
    %102 = vector.broadcast %101 : vector<1x128xf32> to vector<64x128xf32>
    %103 = arith.addf %100, %102 : vector<64x128xf32>
    %cst_68 = arith.constant 0.000000e+00 : f32
    %104 = vector.broadcast %cst_68 : f32 to vector<64x128xf32>
    %105 = arith.maximumf %103, %104 : vector<64x128xf32>
    %106 = arith.truncf %105 : vector<64x128xf32> to vector<64x128xbf16>
    %c0_69 = arith.constant 0 : index
    %c0_70 = arith.constant 0 : index
    %c0_71 = arith.constant 0 : index
    %107 = vector.load %arg9[%c0_69, %c0_70, %c0_71] : memref<1x64x128xbf16, #tpu.memory_space<vmem>>, vector<1x64x128xbf16>
    %108 = vector.shape_cast %107 : vector<1x64x128xbf16> to vector<64x128xbf16>
    %109 = vector.shape_cast %106 : vector<64x128xbf16> to vector<1x64x128xbf16>
    tpu.vector_store %arg9[%c0_69, %c0_70, %c0_71], %109 {strides = array<i32>} : memref<1x64x128xbf16, #tpu.memory_space<vmem>>, vector<1x64x128xbf16>,
    %110 = arith.truncf %105 : vector<64x128xf32> to vector<64x128xbf16>
    %c0_72 = arith.constant 0 : index
    %c0_73 = arith.constant 0 : index
    %111 = vector.load %arg6[%c0_72, %c0_73] : memref<128x128xbf16, #tpu.memory_space<vmem>>, vector<128x128xbf16>
    %cst_74 = arith.constant dense<0.000000e+00> : vector<64x128xf32>
    %112 = tpu.matmul %110, %111, %cst_74 {dimension_numbers = #tpu.dot_dimension_numbers<[1], [0], [0], [1], [0, 0, 1, 1], [], []>} : vector<64x128xbf16>, vector<128x128xbf16>, vector<64x128xf32> -> vector<64x128xf32>
    %c0_75 = arith.constant 0 : index
    %c0_76 = arith.constant 0 : index
    %113 = vector.load %arg7[%c0_75, %c0_76] : memref<1x128xf32, #tpu.memory_space<vmem>>, vector<1x128xf32>
    %114 = vector.broadcast %113 : vector<1x128xf32> to vector<64x128xf32>
    %115 = arith.addf %112, %114 : vector<64x128xf32>
    %c0_77 = arith.constant 0 : index
    %c0_78 = arith.constant 0 : index
    %116 = vector.load %arg8[%c0_77, %c0_78] : memref<1024x64xf32, #tpu.memory_space<vmem>>, vector<1024x64xf32>
    %cst_79 = arith.constant dense<0.000000e+00> : vector<1024x128xf32>
    %117 = tpu.matmul %116, %115, %cst_79 {dimension_numbers = #tpu.dot_dimension_numbers<[1], [0], [0], [1], [0, 0, 1, 1], [], []>} : vector<1024x64xf32>, vector<64x128xf32>, vector<1024x128xf32> -> vector<1024x128xf32>
    %118 = arith.truncf %117 : vector<1024x128xf32> to vector<1024x128xbf16>
    %c0_80 = arith.constant 0 : index
    %c0_81 = arith.constant 0 : index
    %c0_82 = arith.constant 0 : index
    %119 = vector.load %arg10[%c0_80, %c0_81, %c0_82] : memref<1x1024x128xbf16, #tpu.memory_space<vmem>>, vector<1x1024x128xbf16>
    %120 = vector.shape_cast %119 : vector<1x1024x128xbf16> to vector<1024x128xbf16>
    %121 = vector.shape_cast %118 : vector<1024x128xbf16> to vector<1x1024x128xbf16>
    tpu.vector_store %arg10[%c0_80, %c0_81, %c0_82], %121 {strides = array<i32>} : memref<1x1024x128xbf16, #tpu.memory_space<vmem>>, vector<1x1024x128xbf16>,
    return
  }
  func.func @transform_0(%arg0: i32) -> (i32, i32, i32) {
    %c0_i32 = arith.constant 0 : i32
    %c0_i32_0 = arith.constant 0 : i32
    %c0_i32_1 = arith.constant 0 : i32
    return %arg0, %c0_i32, %c0_i32_0 : i32, i32, i32
  }
  func.func @transform_1(%arg0: i32) -> (i32, i32) {
    %c0_i32 = arith.constant 0 : i32
    %c0_i32_0 = arith.constant 0 : i32
    %c0_i32_1 = arith.constant 0 : i32
    return %c0_i32, %c0_i32_0 : i32, i32
  }
  func.func @transform_2(%arg0: i32) -> (i32, i32) {
    %c0_i32 = arith.constant 0 : i32
    %c0_i32_0 = arith.constant 0 : i32
    %c0_i32_1 = arith.constant 0 : i32
    return %c0_i32, %c0_i32_0 : i32, i32
  }
  func.func @transform_3(%arg0: i32) -> (i32, i32, i32) {
    %c0_i32 = arith.constant 0 : i32
    %c0_i32_0 = arith.constant 0 : i32
    %c0_i32_1 = arith.constant 0 : i32
    %c0_i32_2 = arith.constant 0 : i32
    return %c0_i32, %c0_i32_0, %c0_i32_1 : i32, i32, i32
  }
  func.func @transform_4(%arg0: i32) -> (i32, i32) {
    %c0_i32 = arith.constant 0 : i32
    %c0_i32_0 = arith.constant 0 : i32
    %c0_i32_1 = arith.constant 0 : i32
    return %c0_i32, %c0_i32_0 : i32, i32
  }
  func.func @transform_5(%arg0: i32) -> (i32, i32) {
    %c0_i32 = arith.constant 0 : i32
    %c0_i32_0 = arith.constant 0 : i32
    %c0_i32_1 = arith.constant 0 : i32
    return %c0_i32, %c0_i32_0 : i32, i32
  }
  func.func @transform_6(%arg0: i32) -> (i32, i32) {
    %c0_i32 = arith.constant 0 : i32
    %c0_i32_0 = arith.constant 0 : i32
    %c0_i32_1 = arith.constant 0 : i32
    return %c0_i32, %c0_i32_0 : i32, i32
  }
  func.func @transform_7(%arg0: i32) -> (i32, i32) {
    %c0_i32 = arith.constant 0 : i32
    %c0_i32_0 = arith.constant 0 : i32
    %c0_i32_1 = arith.constant 0 : i32
    return %c0_i32, %c0_i32_0 : i32, i32
  }
  func.func @transform_8(%arg0: i32) -> (i32, i32, i32) {
    %c0_i32 = arith.constant 0 : i32
    %c0_i32_0 = arith.constant 0 : i32
    %c0_i32_1 = arith.constant 0 : i32
    return %arg0, %c0_i32, %c0_i32_0 : i32, i32, i32
  }
  func.func @transform_9(%arg0: i32) -> (i32, i32, i32) {
    %c0_i32 = arith.constant 0 : i32
    %c0_i32_0 = arith.constant 0 : i32
    %c0_i32_1 = arith.constant 0 : i32
    return %arg0, %c0_i32, %c0_i32_0 : i32, i32, i32
  }
}

</mosaic_0001>

<bundles_post_ra>
// kernel: deeplab_forward.1
= control target key start
LH: loop header
LB: loop body
LE: loop exit
PB: predicated region body
PF: predicated region fallthrough
CT: control target
= control target key end

     0   :  { %s6504_s30 = smov 0   ;;  %s7769_s0 = inlined_call_operand.vmem [shape: bf16[2,256,32], index: 0, kind: input, shape index: {}]   ;;  %s7770_s1 = inlined_call_operand.vmem [shape: bf16[32,128], index: 1, kind: input, shape index: {}]   ;;  %s7771_s2 = inlined_call_operand.vmem [shape: f32[1,128], index: 2, kind: input, shape index: {}]   ;;  %s7772_s3 = inlined_call_operand.vmem [shape: bf16[9,128,128], index: 3, kind: input, shape index: {}]   ;;  %s7773_s4 = inlined_call_operand.vmem [shape: f32[1,128], index: 4, kind: input, shape index: {}]   ;;  %s7774_s5 = inlined_call_operand.vmem [shape: bf16[128,128], index: 5, kind: input, shape index: {}]   ;;  %s7775_s6 = inlined_call_operand.vmem [shape: f32[1,128], index: 6, kind: input, shape index: {}]   ;;  %s7776_s7 = inlined_call_operand.vmem [shape: f32[1024,64], index: 7, kind: input, shape index: {}]   ;;  %s7777_s8 = inlined_call_operand.vmem [shape: bf16[2,64,128], index: 8, kind: output, shape index: {0}]   ;;  %s7778_s9 = inlined_call_operand.vmem [shape: bf16[2,1024,128], index: 9, kind: output, shape index: {1}]  }
   0x1 LB: > { %s4391_s10 = sadd.s32 4294967295, %s6450_s30   ;;  %p4395_p0 = scmp.ge.s32.totalorder %s6450_s30, 1  ;;  %s6450_s30 = sphi %s6504_s30, %s20_s30  }
   0x2   : > { %p290_p1 = scmp.lt.s32.totalorder %s6450_s30, 3 }
   0x4   : > { %p291_p2 = pnand %p4395_p0, %p290_p1 }
   0x5   : > { %v6346_v0 = vld [vmem:[%s7770_s1] sm:$0xff] (!%p291_p2)   ;;  %p331_p3 = scmp.lt.s32.totalorder (!%p291_p2), %s4391_s10, 1  ;;  %v6347_v1 = vld [vmem:[%s7770_s1 + $0x8] sm:$0xff] (!%p291_p2)   ;;  %vm482_vm0 = vcmask (!%p291_p2), 261120   ;;  %v6366_v8 = vld [vmem:[%s7772_s3 + $0x150] sm:$0xff] (!%p291_p2)   ;;  %v791_v27 = vlaneseq (!%p291_p2)  ;;  %vm6453_vm15 = vmmov (!%p291_p2), 1  }
   0x6   : > { %294 = sbr.rel (%p291_p2) target bundleno = 1421 (0x58d), region = 52  ;;  %6268 = vmatprep.subr.bf16.mxu1 (!%p291_p2), %v6346_v0  ;;  %5768 = vmatprep.subr.bf16.mxu0 (!%p291_p2), %v6346_v0  ;;  %v6364_v2 = vld [vmem:[%s7772_s3 + $0x140] sm:$0xff] (!%p291_p2)   ;;  %v6365_v4 = vld [vmem:[%s7772_s3 + $0x148] sm:$0xff] (!%p291_p2)   ;;  %v6367_v12 = vld [vmem:[%s7772_s3 + $0x158] sm:$0xff] (!%p291_p2)  }
   0x7   : > { %6270 = vmatpush3.bf16.msra.mxu1 (!%p291_p2), %v6346_v0  ;;  %5769 = vmatpush3.bf16.msra.mxu0 (!%p291_p2), %v6346_v0  ;;  %v6368_v17 = vld [vmem:[%s7772_s3 + $0x160] sm:$0xff] (!%p291_p2)   ;;  %v6369_v21 = vld [vmem:[%s7772_s3 + $0x168] sm:$0xff] (!%p291_p2)   ;;  %v6370_v24 = vld [vmem:[%s7772_s3 + $0x170] sm:$0xff] (!%p291_p2)   ;;  %v6588_v28 = vshrl.u32 (!%p291_p2), %v791_v27, 7 }
   0x8   : > { %6269 = vmatprep.subr.bf16.mxu1 (!%p291_p2), %v6347_v1  ;;  %5770 = vmatprep.subr.bf16.mxu0 (!%p291_p2), %v6347_v1  ;;  %v6371_v25 = vld [vmem:[%s7772_s3 + $0x178] sm:$0xff] (!%p291_p2)   ;;  %v6585_v26 = vld [vmem:[%s7772_s3 + $0x100] sm:$0xff] (!%p291_p2)   ;;  %v6442_v33 = vld [vmem:[%s7774_s5 + $0x30] sm:$0xff] (!%p291_p2)  }
   0x9   : > { %v793_v29 = vadd.s32 (!%p291_p2), 8, %v6588_v28  ;;  %v794_v30 = vadd.s32 (!%p291_p2), 16, %v6588_v28  ;;  %v6607_v35 = vld [vmem:[%s7771_s2] ss:$0 sm:$0xff] (!%p291_p2)  ;;  %vm1472_vm4 = vcmp.lt.s32.totalorder (!%p291_p2), %v6588_v28, 1  ;;  %v6443_v34 = vld [vmem:[%s7774_s5 + $0x38] sm:$0xff] (!%p291_p2)  }
   0xb   : > { %6271 = vmatpush3.bf16.msra.mxu1 (!%p291_p2), %v6347_v1  ;;  %5771 = vmatpush3.bf16.msra.mxu0 (!%p291_p2), %v6347_v1  ;;  %v811_v31 = vand.u32 (!%p291_p2), 7, %v793_v29  ;;  %v818_v32 = vand.u32 (!%p291_p2), 7, %v794_v30 }
   0xc   : > { %5804 = vmatprep.subr.bf16.mxu1 (!%p291_p2), %v6364_v2 }
   0xd   : > { %s7796_s10 = smov (!%p331_p3, %s4391_s10), 1  ;;  %vm6592_vm1 = vcmp.ne.s32.totalorder %v811_v31, 0  ;;  %vm6596_vm2 = vcmp.ne.s32.totalorder %v818_v32, 0 }
   0xe   : > { %s4949_s15 = sshll.u32 %s7796_s10, 7  ;;  %vm4664_vm3 = vmpackc.low %vm6596_vm2, %vm6592_vm1  ;;  %s4950_s12 = sshll.u32 %s7796_s10, 5 }
   0xf   : > { %s6527_s20 = scalar_lea.vmem %s7769_s0, %s4949_s15  ;;  %s340_s15 = scalar_lea.vmem %s7777_s8, %s4950_s12 }
  0x10   : > { %v6348_v3 = vld [vmem:[%s6527_s20 + $0x40] sm:$0xff]   ;;  %v6349_v5 = vld [vmem:[%s6527_s20 + $0x48] sm:$0xff]   ;;  %v6350_v6 = vld [vmem:[%s6527_s20 + $0x50] sm:$0xff]   ;;  %s4951_s23 = sshll.u32 %s7796_s10, 9 }
  0x11   : > { %5788 = vmatprep.mubr.msk.bf16.mxu1 %vm482_vm0, %v6348_v3  ;;  %v6352_v7 = vld [vmem:[%s6527_s20] sm:$0xff]   ;;  %v6353_v9 = vld [vmem:[%s6527_s20 + $0x8] sm:$0xff]   ;;  %v6354_v10 = vld [vmem:[%s6527_s20 + $0x10] sm:$0xff]   ;;  %s7622_s11 = scalar_lea.vmem %s7778_s9, %s4951_s23 }
  0x12   : > { %5789 = vmatmul.mubr.msk.bf16.vlgmr.msra.gmra.mrb[0].mxu1 %vm482_vm0, %v6349_v5  ;;  %5772 = vmatprep.mubr.msk.bf16.mxu0 %vm482_vm0, %v6352_v7  ;;  %v6351_v11 = vld [vmem:[%s6527_s20 + $0x58] sm:$0xff]   ;;  %v6356_v14 = vld [vmem:[%s6527_s20 + $0x20] sm:$0xff]   ;;  %v6361_v16 = vld [vmem:[%s6527_s20 + $0x68] sm:$0xff]  }
  0x13   : > { %5792 = vmatprep.mubr.msk.bf16.mxu1 %vm482_vm0, %v6350_v6  ;;  %5805 = vmatpush3.bf16.msra.mxu1 %v6364_v2  ;;  %v6355_v13 = vld [vmem:[%s6527_s20 + $0x18] sm:$0xff]   ;;  %v6360_v15 = vld [vmem:[%s6527_s20 + $0x60] sm:$0xff]   ;;  %v6357_v18 = vld [vmem:[%s6527_s20 + $0x28] sm:$0xff]  }
  0x14   : > { %5806 = vmatprep.subr.bf16.mxu1 %v6365_v4  ;;  %5773 = vmatmul.mubr.msk.bf16.vlgmr.msra.gmra.mrb[0].mxu0 %vm482_vm0, %v6353_v9  ;;  %v6362_v19 = vld [vmem:[%s6527_s20 + $0x70] sm:$0xff]   ;;  %v6363_v22 = vld [vmem:[%s6527_s20 + $0x78] sm:$0xff]   ;;  %v6373_v5 = vld [vmem:[%s7772_s3 + $0x108] sm:$0xff]  }
  0x15   : > { %5776 = vmatprep.mubr.msk.bf16.mxu0 %vm482_vm0, %v6354_v10  ;;  %v6358_v20 = vld [vmem:[%s6527_s20 + $0x30] sm:$0xff]   ;;  %v6359_v23 = vld [vmem:[%s6527_s20 + $0x38] sm:$0xff]  }
  0x17   : > { %5807 = vmatpush3.bf16.msra.mxu1 %v6365_v4 }
  0x18   : > { %5808 = vmatprep.subr.bf16.mxu1 %v6366_v8 }
  0x1a   : > { %5793 = vmatmul.mubr.msk.bf16.gmra.mrb[4].mxu1 %vm482_vm0, %v6351_v11 }
  0x1b   : > { %5809 = vmatpush3.bf16.msra.mxu1 %v6366_v8  ;;  %5796 = vmatprep.mubr.msk.bf16.mxu1 %vm482_vm0, %v6360_v15 }
  0x1c   : > { %5810 = vmatprep.subr.bf16.mxu1 %v6367_v12  ;;  %5777 = vmatmul.mubr.msk.bf16.gmra.mrb[4].mxu0 %vm482_vm0, %v6355_v13 }
  0x1d   : > { %5780 = vmatprep.mubr.msk.bf16.mxu0 %vm482_vm0, %v6356_v14 }
  0x1f   : > { %5811 = vmatpush3.bf16.msra.mxu1 %v6367_v12 }
  0x20   : > { %5812 = vmatprep.subr.bf16.mxu1 %v6368_v17 }
  0x22   : > { %5797 = vmatmul.mubr.msk.bf16.gmra.mrb[8].mxu1 %vm482_vm0, %v6361_v16 }
  0x23   : > { %5800 = vmatprep.mubr.msk.bf16.mxu1 %vm482_vm0, %v6362_v19  ;;  %5813 = vmatpush3.bf16.msra.mxu1 %v6368_v17 }
  0x24   : > { %5814 = vmatprep.subr.bf16.mxu1 %v6369_v21  ;;  %5781 = vmatmul.mubr.msk.bf16.gmra.mrb[8].mxu0 %vm482_vm0, %v6357_v18 }
  0x25   : > { %5784 = vmatprep.mubr.msk.bf16.mxu0 %vm482_vm0, %v6358_v20 }
  0x27   : > { %5815 = vmatpush3.bf16.msra.mxu1 %v6369_v21 }
  0x28   : > { %5816 = vmatprep.subr.bf16.mxu1 %v6370_v24 }
  0x2a   : > { %5801 = vmatmul.mubr.msk.bf16.gmra.mrb[12].mxu1 %vm482_vm0, %v6363_v22 }
  0x2b   : > { %5817 = vmatpush3.bf16.msra.mxu1 %v6370_v24  ;;  %v6374_v24 = vld [vmem:[%s7772_s3 + $0x110] sm:$0xff]  }
  0x2c   : > { %5785 = vmatmul.mubr.msk.bf16.gmra.mrb[12].mxu0 %vm482_vm0, %v6359_v23  ;;  %5818 = vmatprep.subr.bf16.mxu1 %v6371_v25 }
  0x2f   : > { %5819 = vmatpush3.bf16.msra.mxu1 %v6371_v25 }
  0x30   : > { %5828 = vmatprep.subr.bf16.mxu1 %v6585_v26 }
  0xe5   : > { %v5790_v36 = vpop.f32.mrb[0].mxu1 }
  0xe6   : > { %v638_v37 = vadd.f32 %v5790_v36, %v6607_v35  ;;  %v629_v38 = vpop.f32.mrb[1].mxu1 }
  0xe7   : > { %v630_v39 = vadd.f32 %v6607_v35, %v629_v38  ;;  %v5791_v40 = vpop.f32.mrb[2].mxu1  ;;  %v5774_v44 = vpop.f32.mrb[0].mxu0 }
  0xe8   : > { %v710_v41 = vmax.f32 %v638_v37, 0.0  ;;  %v641_v42 = vadd.f32 %v5791_v40, %v6607_v35  ;;  %v632_v43 = vpop.f32.mrb[3].mxu1  ;;  %v574_v47 = vadd.f32 %v5774_v44, %v6607_v35  ;;  %v565_v48 = vpop.f32.mrb[1].mxu0 }
  0xe9   : > { %v708_v45 = vmax.f32 %v630_v39, 0.0  ;;  %v633_v46 = vadd.f32 %v6607_v35, %v632_v43  ;;  %v566_v50 = vadd.f32 %v6607_v35, %v565_v48  ;;  %v5775_v51 = vpop.f32.mrb[2].mxu0 }
  0xea   : > { %v711_v49 = vmax.f32 %v641_v42, 0.0  ;;  %v1466_v52 = vrot.slane %v710_v41, 7  ;;  %v694_v54 = vmax.f32 %v574_v47, 0.0  ;;  %v577_v55 = vadd.f32 %v5775_v51, %v6607_v35  ;;  %v568_v56 = vpop.f32.mrb[3].mxu0  ;;  %v6375_v47 = vld [vmem:[%s7772_s3 + $0x118] sm:$0xff]  }
  0xeb   : > { %v709_v53 = vmax.f32 %v633_v46, 0.0  ;;  %v692_v59 = vmax.f32 %v566_v50, 0.0  ;;  %v569_v60 = vadd.f32 %v6607_v35, %v568_v56  ;;  %v1464_v61 = vrot.slane %v708_v45, 7 }
  0xec   : > { %v934_v57 = vpack.c.bf16 %v711_v49, %v710_v41  ;;  %v1467_v58 = vrot.slane %v711_v49, 7  ;;  %v695_v1 = vmax.f32 %v577_v55, 0.0 }
  0xed   : > { %v933_v62 = vpack.c.bf16 %v709_v53, %v708_v45  ;;  %v1465_v63 = vrot.slane %v709_v53, 7  ;;  %v5794_v0 = vpop.f32.mrb[4].mxu1  ;;  %v693_v6 = vmax.f32 %v569_v60, 0.0 }
  0xee   : > { %v6620_v2 = vsel %vm1472_vm4, %v1466_v52, %v1467_v58  ;;  %v654_v3 = vadd.f32 %v5794_v0, %v6607_v35  ;;  %v645_v4 = vpop.f32.mrb[5].mxu1  ;;  %v6635_v11 = vpack.c.bf16 %v695_v1, %v694_v54 }
  0xef   : > { %v6628_v7 = vsel %vm1472_vm4, %v1465_v63, %v1466_v52  ;;  %v6632_v8 = vsel %vm1472_vm4, %v1464_v61, %v1465_v63  ;;  %v646_v9 = vadd.f32 %v6607_v35, %v645_v4  ;;  %v5795_v10 = vpop.f32.mrb[6].mxu1  ;;  %5820 = vmatprep.mubr.bf16.mxu1 %v933_v62  ;;  %v912_v16 = vpack.c.bf16 %v693_v6, %v692_v59  ;;  %v5778_v17 = vpop.f32.mrb[4].mxu0 }
  0xf0   : > { %v4561_v12 = vpack.c.bf16 %v6620_v2, %v6628_v7  ;;  %v714_v13 = vmax.f32 %v654_v3, 0.0  ;;  %v657_v14 = vadd.f32 %v5795_v10, %v6607_v35  ;;  %v648_v15 = vpop.f32.mrb[7].mxu1  ;;  %5821 = vmatmul.mubr.bf16.vlgmr.msra.gmra.mrb[16].mxu1 %v934_v57  ;;  %v590_v20 = vadd.f32 %v5778_v17, %v6607_v35  ;;  %v581_v21 = vpop.f32.mrb[5].mxu0  ;;  %v6376_v3 = vld [vmem:[%s7772_s3 + $0x120] sm:$0xff]   ;;  %v6406_v7 = vld [vmem:[%s7772_s3 + $0x190] sm:$0xff]  }
  0xf1   : > { %v712_v18 = vmax.f32 %v646_v9, 0.0  ;;  %v649_v19 = vadd.f32 %v6607_v35, %v648_v15  ;;  %5829 = vmatpush3.bf16.msra.mxu1 %v6585_v26  ;;  %v582_v25 = vadd.f32 %v6607_v35, %v581_v21  ;;  %v5779_v27 = vpop.f32.mrb[6].mxu0 }
  0xf2   : > { %v1470_v22 = vrot.slane %v714_v13, 7  ;;  %v715_v23 = vmax.f32 %v657_v14, 0.0  ;;  %5830 = vmatprep.subr.bf16.mxu1 %v6373_v5  ;;  %v698_v31 = vmax.f32 %v590_v20, 0.0  ;;  %v593_v32 = vadd.f32 %v5779_v27, %v6607_v35  ;;  %v584_v36 = vpop.f32.mrb[7].mxu0 }
  0xf3   : > { %v1468_v29 = vrot.slane %v712_v18, 7  ;;  %v713_v30 = vmax.f32 %v649_v19, 0.0  ;;  %v696_v38 = vmax.f32 %v582_v25, 0.0  ;;  %v585_v39 = vadd.f32 %v6607_v35, %v584_v36  ;;  %v6377_v25 = vld [vmem:[%s7772_s3 + $0x128] sm:$0xff]  }
  0xf4   : > { %v936_v26 = vpack.c.bf16 %v715_v23, %v714_v13  ;;  %v1471_v37 = vrot.slane %v715_v23, 7  ;;  %v699_v43 = vmax.f32 %v593_v32, 0.0 }
  0xf5   : > { %v6651_v40 = vsel %vm1472_vm4, %v1467_v58, %v1468_v29  ;;  %v935_v41 = vpack.c.bf16 %v713_v30, %v712_v18  ;;  %v1469_v42 = vrot.slane %v713_v30, 7  ;;  %5831 = vmatpush3.bf16.msra.mxu1 %v6373_v5  ;;  %v5798_v44 = vpop.f32.mrb[8].mxu1  ;;  %v697_v48 = vmax.f32 %v585_v39, 0.0 }
  0xf6   : > { %v6655_v45 = vsel %vm1472_vm4, %v1470_v22, %v1471_v37  ;;  %v6659_v46 = vsel %vm1472_vm4, %v1471_v37, %v1464_v61  ;;  %5832 = vmatprep.subr.bf16.mxu1 %v6374_v24  ;;  %v670_v49 = vadd.f32 %v5798_v44, %v6607_v35  ;;  %v661_v50 = vpop.f32.mrb[9].mxu1  ;;  %v6673_v53 = vpack.c.bf16 %v699_v43, %v698_v31 }
  0xf7   : > { %v6667_v51 = vsel %vm1472_vm4, %v1469_v42, %v1470_v22  ;;  %v6671_v52 = vsel %vm1472_vm4, %v1468_v29, %v1469_v42  ;;  %5824 = vmatprep.mubr.bf16.mxu1 %v935_v41  ;;  %v662_v54 = vadd.f32 %v6607_v35, %v661_v50  ;;  %v5799_v55 = vpop.f32.mrb[10].mxu1  ;;  %v6676_v56 = vpack.c.bf16 %v697_v48, %v696_v38  ;;  %v5782_v57 = vpop.f32.mrb[8].mxu0 }
  0xf8   : > { %5825 = vmatmul.mubr.bf16.gmra.mrb[20].mxu1 %v936_v26  ;;  %v6678_v58 = vmax.f32 %v670_v49, 0.0  ;;  %v673_v59 = vadd.f32 %v5799_v55, %v6607_v35  ;;  %v664_v60 = vpop.f32.mrb[11].mxu1  ;;  %v4558_v61 = vpack.c.bf16 %v6632_v8, %v6659_v46  ;;  %v606_v62 = vadd.f32 %v5782_v57, %v6607_v35  ;;  %v597_v63 = vpop.f32.mrb[9].mxu0  ;;  %v6378_v57 = vld [vmem:[%s7772_s3 + $0x130] sm:$0xff]  }
  0xf9   : > { %5833 = vmatpush3.bf16.msra.mxu1 %v6374_v24  ;;  %5844 = vmatprep.mubr.bf16.mxu1 %v912_v16  ;;  %v6684_v0 = vmax.f32 %v662_v54, 0.0  ;;  %v665_v1 = vadd.f32 %v6607_v35, %v664_v60  ;;  %v6691_v4 = vadd.f32 %v6607_v35, %v597_v63  ;;  %v5783_v5 = vpop.f32.mrb[10].mxu0  ;;  %v4564_v38 = vpack.c.bf16 %v6671_v52, %v6651_v40  ;;  %v6402_v46 = vld [vmem:[%s7772_s3 + $0xf0] sm:$0xff]   ;;  %v6436_v40 = vld [vmem:[%s7774_s5] sm:$0xff]   ;;  %v6437_v52 = vld [vmem:[%s7774_s5 + $0x8] sm:$0xff]  }
  0xfa   : > { %5834 = vmatprep.subr.bf16.mxu1 %v6375_v47  ;;  %v1633_v6 = vrot.slane %v6678_v58, 7  ;;  %v6694_v9 = vmax.f32 %v673_v59, 0.0  ;;  %v702_v10 = vmax.f32 %v606_v62, 0.0  ;;  %v609_v13 = vadd.f32 %v5783_v5, %v6607_v35  ;;  %v600_v14 = vpop.f32.mrb[11].mxu0  ;;  %6020 = vmatprep.subr.bf16.mxu0 %v6436_v40 }
  0xfb   : > { %v6697_v15 = vmax.f32 %v665_v1, 0.0  ;;  %v700_v16 = vmax.f32 %v6691_v4, 0.0  ;;  %v601_v17 = vadd.f32 %v6607_v35, %v600_v14  ;;  %v1631_v62 = vrot.slane %v6684_v0, 7  ;;  %6021 = vmatpush3.bf16.msra.mxu0 %v6436_v40  ;;  %v6417_v4 = vld [vmem:[%s7772_s3 + $0x68] sm:$0xff]  }
  0xfc   : > { %v1323_v18 = vpack.c.bf16 %v6694_v9, %v6678_v58  ;;  %v1634_v19 = vrot.slane %v6694_v9, 7  ;;  %v703_v20 = vmax.f32 %v609_v13, 0.0  ;;  %v795_v8 = vadd.s32 24, %v6588_v28  ;;  %6022 = vmatprep.subr.bf16.mxu0 %v6437_v52 }
  0xfd   : > { %5835 = vmatpush3.bf16.msra.mxu1 %v6375_v47  ;;  %v1632_v21 = vrot.slane %v6697_v15, 7  ;;  %v1956_v22 = vpack.c.bf16 %v6678_v58, %v6697_v15  ;;  %v5802_v23 = vpop.f32.mrb[12].mxu1  ;;  %v1322_v24 = vpack.c.bf16 %v6697_v15, %v6684_v0  ;;  %v701_v27 = vmax.f32 %v601_v17, 0.0  ;;  %v6431_v58 = vld [vmem:[%s7772_s3 + $0x18] sm:$0xff]   ;;  %v6433_v15 = vld [vmem:[%s7772_s3 + $0x28] sm:$0xff]  }
  0xfe   : > { %5836 = vmatprep.subr.bf16.mxu1 %v6376_v3  ;;  %v6716_v29 = vsel %vm1472_vm4, %v1633_v6, %v1634_v19  ;;  %v686_v30 = vadd.f32 %v5802_v23, %v6607_v35  ;;  %v677_v31 = vpop.f32.mrb[13].mxu1  ;;  %v6719_v32 = vpack.c.bf16 %v703_v20, %v702_v10 }
  0xff   : > { %v6723_v36 = vsel %vm1472_vm4, %v1632_v21, %v1633_v6  ;;  %v678_v26 = vadd.f32 %v6607_v35, %v677_v31  ;;  %v5803_v37 = vpop.f32.mrb[14].mxu1  ;;  %v6730_v39 = vpack.c.bf16 %v701_v27, %v700_v16  ;;  %v6732_v41 = vpack.c.bf16 %v702_v10, %v701_v27  ;;  %v5786_v42 = vpop.f32.mrb[12].mxu0  ;;  %v6379_v31 = vld [vmem:[%s7772_s3 + $0x138] sm:$0xff]   ;;  %6023 = vmatpush3.bf16.msra.mxu0 %v6437_v52 }
 0x100   : > { %v4597_v43 = vpack.c.bf16 %v6716_v29, %v6723_v36  ;;  %v6736_v44 = vmax.f32 %v686_v30, 0.0  ;;  %v680_v47 = vpop.f32.mrb[15].mxu1  ;;  %v622_v48 = vadd.f32 %v5786_v42, %v6607_v35  ;;  %v613_v49 = vpop.f32.mrb[13].mxu0  ;;  %v689_v54 = vadd.f32 %v5803_v37, %v6607_v35 }
 0x101   : > { %5837 = vmatpush3.bf16.msra.mxu1 %v6376_v3  ;;  %v6739_v50 = vmax.f32 %v678_v26, 0.0  ;;  %v681_v55 = vadd.f32 %v6607_v35, %v680_v47  ;;  %v614_v59 = vadd.f32 %v6607_v35, %v613_v49  ;;  %v5787_v60 = vpop.f32.mrb[14].mxu0 }
 0x102   : > { %5838 = vmatprep.subr.bf16.mxu1 %v6377_v25  ;;  %v706_v63 = vmax.f32 %v622_v48, 0.0  ;;  %v625_v1 = vadd.f32 %v5787_v60, %v6607_v35  ;;  %v616_v3 = vpop.f32.mrb[15].mxu0  ;;  %v1637_v5 = vrot.slane %v6736_v44, 7  ;;  %v723_v6 = vmax.f32 %v689_v54, 0.0 }
 0x103   : > { %v704_v10 = vmax.f32 %v614_v59, 0.0  ;;  %v617_v13 = vadd.f32 %v6607_v35, %v616_v3  ;;  %v6751_v14 = vmax.f32 %v681_v55, 0.0  ;;  %v1635_v23 = vrot.slane %v6739_v50, 7 }
 0x104   : > { %v707_v17 = vmax.f32 %v625_v1, 0.0  ;;  %v6755_v27 = vpack.c.bf16 %v723_v6, %v6736_v44  ;;  %v1638_v30 = vrot.slane %v723_v6, 7  ;;  %v6779_v55 = vsel %vm1472_vm4, %v1631_v62, %v1632_v21  ;;  %v6380_v21 = vld [vmem:[%s7772_s3 + $0x1c0] sm:$0xff]  }
 0x105   : > { %5839 = vmatpush3.bf16.msra.mxu1 %v6377_v25  ;;  %v6760_v26 = vpack.c.bf16 %v704_v10, %v703_v20  ;;  %v705_v37 = vmax.f32 %v617_v13, 0.0  ;;  %v1636_v35 = vrot.slane %v6751_v14, 7  ;;  %v1324_v25 = vpack.c.bf16 %v6751_v14, %v6739_v50 }
 0x106   : > { %5840 = vmatprep.subr.bf16.mxu1 %v6378_v57  ;;  %v1183_v42 = vpack.c.bf16 %v707_v17, %v706_v63  ;;  %v6767_v47 = vsel %vm1472_vm4, %v1637_v5, %v1638_v30  ;;  %v6771_v48 = vsel %vm1472_vm4, %v1638_v30, %v1631_v62  ;;  %v4567_v20 = vpack.c.bf16 %v6655_v45, %v6667_v51  ;;  %v6382_v30 = vld [vmem:[%s7772_s3 + $0x1d0] sm:$0xff]   ;;  %v6408_v45 = vld [vmem:[%s7772_s3 + $0x1a0] sm:$0xff]  }
 0x107   : > { %v1182_v49 = vpack.c.bf16 %v705_v37, %v704_v10  ;;  %v6773_v54 = vpack.c.bf16 %v706_v63, %v705_v37  ;;  %v6783_v59 = vsel %vm1472_vm4, %v1635_v23, %v1636_v35  ;;  %v6789_v60 = vsel %vm1472_vm4, %v1634_v19, %v1635_v23  ;;  %v6381_v23 = vld [vmem:[%s7772_s3 + $0x1c8] sm:$0xff]   ;;  %v6388_v37 = vld [vmem:[%s7772_s3 + $0x200] sm:$0xff]   ;;  %v6438_v51 = vld [vmem:[%s7774_s5 + $0x10] sm:$0xff]  }
 0x108   : > { %v6793_v63 = vsel %vm1472_vm4, %v1636_v35, %v1637_v5  ;;  %v4665_v62 = vpack.c.bf16 %v6723_v36, %v6779_v55  ;;  %v4600_v1 = vpack.c.bf16 %v6783_v59, %v6789_v60  ;;  %v1957_v3 = vpack.c.bf16 %v6739_v50, %v6694_v9  ;;  %v6389_v35 = vld [vmem:[%s7772_s3 + $0x208] sm:$0xff]   ;;  %6024 = vmatprep.subr.bf16.mxu0 %v6438_v51  ;;  %v6432_v9 = vld [vmem:[%s7772_s3 + $0x20] sm:$0xff]  }
 0x109   : > { %5841 = vmatpush3.bf16.msra.mxu1 %v6378_v57  ;;  %v4594_v57 = vpack.c.bf16 %v6779_v55, %v6771_v48  ;;  %v4603_v19 = vpack.c.bf16 %v6767_v47, %v6793_v63  ;;  %v1958_v5 = vpack.c.bf16 %v6736_v44, %v6751_v14  ;;  %v6452_v6 = vmov 0.0   ;;  %6025 = vmatpush3.bf16.msra.mxu0 %v6438_v51  ;;  %v6419_v47 = vld [vmem:[%s7772_s3 + $0x78] sm:$0xff]   ;;  %v2445_v51 = vld [vmem:[%s7776_s7] sm:$0xff] }
 0x10a   : > { %5842 = vmatprep.subr.bf16.mxu1 %v6379_v31  ;;  %v6812_v10 = vpack.c.bf16 %v6771_v48, %v6452_v6  ;;  %v4668_v13 = vpack.c.bf16 %v6789_v60, %v6716_v29  ;;  %v4671_v17 = vpack.c.bf16 %v6793_v63, %v6783_v59  ;;  %v6439_v48 = vld [vmem:[%s7774_s5 + $0x18] sm:$0xff]   ;;  %v4673_v29 = vld [vmem:[%s7773_s4] ss:$0 sm:$0xff] }
 0x10b   : > { %6026 = vmatprep.subr.bf16.mxu0 %v6439_v48  ;;  %v6435_v44 = vld [vmem:[%s7772_s3 + $0x38] sm:$0xff]  }
 0x10d   : > { %5843 = vmatpush3.bf16.msra.mxu1 %v6379_v31  ;;  %v6383_v31 = vld [vmem:[%s7772_s3 + $0x1d8] sm:$0xff]   ;;  %6027 = vmatpush3.bf16.msra.mxu0 %v6439_v48  ;;  %v4682_v48 = vld [vmem:[%s7775_s6] ss:$0 sm:$0xff] }
 0x10e   : > { %5852 = vmatprep.subr.bf16.mxu1 %v6380_v21 }
 0x110   : > { %5845 = vmatmul.mubr.bf16.vlgmr.msra.gmra.mrb[16].mxu1 %v6635_v11  ;;  %v6384_v11 = vld [vmem:[%s7772_s3 + $0x1e0] sm:$0xff]  }
 0x111   : > { %5853 = vmatpush3.bf16.msra.mxu1 %v6380_v21  ;;  %5848 = vmatprep.mubr.bf16.mxu1 %v6676_v56  ;;  %v6385_v56 = vld [vmem:[%s7772_s3 + $0x1e8] sm:$0xff]   ;;  %v6390_v21 = vld [vmem:[%s7772_s3 + $0x210] sm:$0xff]  }
 0x112   : > { %5854 = vmatprep.subr.bf16.mxu1 %v6381_v23 }
 0x115   : > { %5855 = vmatpush3.bf16.msra.mxu1 %v6381_v23  ;;  %v6391_v23 = vld [vmem:[%s7772_s3 + $0x218] sm:$0xff]  }
 0x116   : > { %5856 = vmatprep.subr.bf16.mxu1 %v6382_v30 }
 0x118   : > { %5849 = vmatmul.mubr.bf16.gmra.mrb[20].mxu1 %v6673_v53  ;;  %v6386_v53 = vld [vmem:[%s7772_s3 + $0x1f0] sm:$0xff]  }
 0x119   : > { %5857 = vmatpush3.bf16.msra.mxu1 %v6382_v30  ;;  %5868 = vmatprep.mubr.bf16.mxu1 %v6730_v39  ;;  %v6387_v39 = vld [vmem:[%s7772_s3 + $0x1f8] sm:$0xff]   ;;  %v6396_v30 = vld [vmem:[%s7772_s3 + $0xc0] sm:$0xff]  }
 0x11a   : > { %5858 = vmatprep.subr.bf16.mxu1 %v6383_v31 }
 0x11d   : > { %5859 = vmatpush3.bf16.msra.mxu1 %v6383_v31  ;;  %v6397_v31 = vld [vmem:[%s7772_s3 + $0xc8] sm:$0xff]  }
 0x11e   : > { %5860 = vmatprep.subr.bf16.mxu1 %v6384_v11 }
 0x121   : > { %5861 = vmatpush3.bf16.msra.mxu1 %v6384_v11  ;;  %v804_v11 = vand.u32 7, %v6588_v28 }
 0x122   : > { %5862 = vmatprep.subr.bf16.mxu1 %v6385_v56 }
 0x123   : > { %vm6887_vm5 = vcmp.ne.s32.totalorder %v804_v11, 0 }
 0x124   : > { %vm4557_vm6 = vmpackc.low %vm6592_vm1, %vm6887_vm5  ;;  %vm2573_vm1 = vcmask 523264  }
 0x125   : > { %5863 = vmatpush3.bf16.msra.mxu1 %v6385_v56  ;;  %v6398_v56 = vld [vmem:[%s7772_s3 + $0xd0] sm:$0xff]   ;;  %vm4661_vm0 = vmpackc.low %vm6887_vm5, %vm6453_vm15 }
 0x126   : > { %5864 = vmatprep.subr.bf16.mxu1 %v6386_v53 }
 0x129   : > { %5865 = vmatpush3.bf16.msra.mxu1 %v6386_v53 }
 0x12a   : > { %5866 = vmatprep.subr.bf16.mxu1 %v6387_v39 }
 0x12d   : > { %5867 = vmatpush3.bf16.msra.mxu1 %v6387_v39  ;;  %v797_v39 = vadd.s32 40, %v6588_v28 }
 0x12e   : > { %5876 = vmatprep.subr.bf16.mxu1 %v6388_v37 }
 0x130   : > { %5869 = vmatmul.mubr.bf16.vlgmr.msra.gmra.mrb[16].mxu1 %v6719_v32  ;;  %v6392_v32 = vld [vmem:[%s7772_s3 + $0x220] sm:$0xff]  }
 0x131   : > { %5877 = vmatpush3.bf16.msra.mxu1 %v6388_v37  ;;  %5872 = vmatprep.mubr.bf16.mxu1 %v1182_v49  ;;  %v6393_v49 = vld [vmem:[%s7772_s3 + $0x228] sm:$0xff]   ;;  %v825_v37 = vand.u32 7, %v795_v8  ;;  %v6412_v8 = vld [vmem:[%s7772_s3 + $0x40] sm:$0xff]  }
 0x132   : > { %5878 = vmatprep.subr.bf16.mxu1 %v6389_v35 }
 0x133   : > { %vm6922_vm7 = vcmp.ne.s32.totalorder %v825_v37, 0  ;;  %v6421_v37 = vld [vmem:[%s7772_s3 + $0x88] sm:$0xff]  }
 0x134   : > { %vm4560_vm10 = vmpackc.low %vm6922_vm7, %vm6596_vm2 }
 0x135   : > { %5879 = vmatpush3.bf16.msra.mxu1 %v6389_v35  ;;  %v6403_v35 = vld [vmem:[%s7772_s3 + $0xf8] sm:$0xff]  }
 0x136   : > { %5880 = vmatprep.subr.bf16.mxu1 %v6390_v21 }
 0x138   : > { %5873 = vmatmul.mubr.bf16.gmra.mrb[20].mxu1 %v1183_v42  ;;  %v6394_v42 = vld [vmem:[%s7772_s3 + $0x230] sm:$0xff]  }
 0x139   : > { %5881 = vmatpush3.bf16.msra.mxu1 %v6390_v21  ;;  %5892 = vmatprep.mubr.bf16.mxu1 %v1322_v24  ;;  %v6395_v24 = vld [vmem:[%s7772_s3 + $0x238] sm:$0xff]  }
 0x13a   : > { %5882 = vmatprep.subr.bf16.mxu1 %v6391_v23 }
 0x13d   : > { %5883 = vmatpush3.bf16.msra.mxu1 %v6391_v23  ;;  %v839_v23 = vand.u32 7, %v797_v39  ;;  %v1805_v39 = vpack.c.bf16 %v700_v16, %v6452_v6  ;;  %v6418_v16 = vld [vmem:[%s7772_s3 + $0x70] sm:$0xff]  }
 0x13e   : > { %5884 = vmatprep.subr.bf16.mxu1 %v6392_v32 }
 0x13f   : > { %vm6935_vm9 = vcmp.ne.s32.totalorder %v839_v23, 0  ;;  %v1955_v23 = vpack.c.bf16 %v6684_v0, %v6452_v6  ;;  %v6426_v0 = vld [vmem:[%s7772_s3 + $0xb0] sm:$0xff]   ;;  %v6428_v6 = vld [vmem:[%s7772_s3] sm:$0xff]  }
 0x141   : > { %5885 = vmatpush3.bf16.msra.mxu1 %v6392_v32 }
 0x142   : > { %5886 = vmatprep.subr.bf16.mxu1 %v6393_v49 }
 0x145   : > { %5887 = vmatpush3.bf16.msra.mxu1 %v6393_v49  ;;  %v6404_v49 = vld [vmem:[%s7772_s3 + $0x180] sm:$0xff]  }
 0x146   : > { %5888 = vmatprep.subr.bf16.mxu1 %v6394_v42 }
 0x149   : > { %5889 = vmatpush3.bf16.msra.mxu1 %v6394_v42  ;;  %v798_v42 = vadd.s32 48, %v6588_v28 }
 0x14a   : > { %5890 = vmatprep.subr.bf16.mxu1 %v6395_v24 }
 0x14b   : > { %v846_v11 = vand.u32 7, %v798_v42  ;;  %v6430_v42 = vld [vmem:[%s7772_s3 + $0x10] sm:$0xff]  }
 0x14d   : > { %5891 = vmatpush3.bf16.msra.mxu1 %v6395_v24  ;;  %v799_v24 = vadd.s32 56, %v6588_v28  ;;  %vm6966_vm12 = vcmp.ne.s32.totalorder %v846_v11, 0 }
 0x14e   : > { %5900 = vmatprep.subr.bf16.mxu1 %v6396_v30  ;;  %vm4670_vm5 = vmpackc.low %vm6966_vm12, %vm6935_vm9 }
 0x150   : > { %5893 = vmatmul.mubr.bf16.vlgmr.msra.gmra.mrb[16].mxu1 %v1323_v18  ;;  %v6399_v18 = vld [vmem:[%s7772_s3 + $0xd8] sm:$0xff]  }
 0x151   : > { %5901 = vmatpush3.bf16.msra.mxu1 %v6396_v30  ;;  %5896 = vmatprep.mubr.bf16.mxu1 %v1324_v25  ;;  %v6400_v25 = vld [vmem:[%s7772_s3 + $0xe0] sm:$0xff]  }
 0x152   : > { %5902 = vmatprep.subr.bf16.mxu1 %v6397_v31 }
 0x155   : > { %5903 = vmatpush3.bf16.msra.mxu1 %v6397_v31 }
 0x156   : > { %5904 = vmatprep.subr.bf16.mxu1 %v6398_v56 }
 0x158   : > { %5897 = vmatmul.mubr.bf16.gmra.mrb[20].mxu1 %v6755_v27  ;;  %v6401_v27 = vld [vmem:[%s7772_s3 + $0xe8] sm:$0xff]  }
 0x159   : > { %5905 = vmatpush3.bf16.msra.mxu1 %v6398_v56  ;;  %5916 = vmatprep.mubr.msk.bf16.mxu1 %vm4557_vm6, %v4558_v61  ;;  %v796_v61 = vadd.s32 32, %v6588_v28  ;;  %v6405_v28 = vld [vmem:[%s7772_s3 + $0x188] sm:$0xff]   ;;  %v853_v56 = vand.u32 7, %v799_v24 }
 0x15a   : > { %5906 = vmatprep.subr.bf16.mxu1 %v6399_v18 }
 0x15b   : > { %v832_v21 = vand.u32 7, %v796_v61  ;;  %vm6970_vm13 = vcmp.ne.s32.totalorder %v853_v56, 0  ;;  %v6414_v61 = vld [vmem:[%s7772_s3 + $0x50] sm:$0xff]  }
 0x15c   : > { %vm4566_vm14 = vmpackc.low %vm6970_vm13, %vm6966_vm12 }
 0x15d   : > { %5907 = vmatpush3.bf16.msra.mxu1 %v6399_v18  ;;  %vm6931_vm8 = vcmp.ne.s32.totalorder %v832_v21, 0  ;;  %v6423_v21 = vld [vmem:[%s7772_s3 + $0x98] sm:$0xff]  }
 0x15e   : > { %5908 = vmatprep.subr.bf16.mxu1 %v6400_v25  ;;  %vm4563_vm11 = vmpackc.low %vm6935_vm9, %vm6931_vm8 }
 0x15f   : > { %vm4667_vm4 = vmpackc.low %vm6931_vm8, %vm6922_vm7 }
 0x161   : > { %5909 = vmatpush3.bf16.msra.mxu1 %v6400_v25  ;;  %v6411_v25 = vld [vmem:[%s7772_s3 + $0x1b8] sm:$0xff]  }
 0x162   : > { %5910 = vmatprep.subr.bf16.mxu1 %v6401_v27 }
 0x165   : > { %5911 = vmatpush3.bf16.msra.mxu1 %v6401_v27  ;;  %v6441_v27 = vld [vmem:[%s7774_s5 + $0x28] sm:$0xff]  }
 0x166   : > { %5912 = vmatprep.subr.bf16.mxu1 %v6402_v46 }
 0x169   : > { %5913 = vmatpush3.bf16.msra.mxu1 %v6402_v46  ;;  %v6413_v46 = vld [vmem:[%s7772_s3 + $0x48] sm:$0xff]  }
 0x16a   : > { %5914 = vmatprep.subr.bf16.mxu1 %v6403_v35 }
 0x16d   : > { %5915 = vmatpush3.bf16.msra.mxu1 %v6403_v35  ;;  %v6422_v35 = vld [vmem:[%s7772_s3 + $0x90] sm:$0xff]  }
 0x16e   : > { %5924 = vmatprep.subr.bf16.mxu1 %v6404_v49 }
 0x170   : > { %5917 = vmatmul.mubr.msk.bf16.vlgmr.msra.gmra.mrb[16].mxu1 %vm4560_vm10, %v4561_v12  ;;  %v6407_v12 = vld [vmem:[%s7772_s3 + $0x198] sm:$0xff]  }
 0x171   : > { %5920 = vmatprep.mubr.msk.bf16.mxu1 %vm4563_vm11, %v4564_v38  ;;  %5925 = vmatpush3.bf16.msra.mxu1 %v6404_v49  ;;  %v6409_v38 = vld [vmem:[%s7772_s3 + $0x1a8] sm:$0xff]  }
 0x172   : > { %5926 = vmatprep.subr.bf16.mxu1 %v6405_v28  ;;  %v6429_v49 = vld [vmem:[%s7772_s3 + $0x8] sm:$0xff]  }
 0x175   : > { %5927 = vmatpush3.bf16.msra.mxu1 %v6405_v28 }
 0x176   : > { %5928 = vmatprep.subr.bf16.mxu1 %v6406_v7 }
 0x178   : > { %5921 = vmatmul.mubr.msk.bf16.gmra.mrb[20].mxu1 %vm4566_vm14, %v4567_v20  ;;  %v6410_v20 = vld [vmem:[%s7772_s3 + $0x1b0] sm:$0xff]  }
 0x179   : > { %5929 = vmatpush3.bf16.msra.mxu1 %v6406_v7  ;;  %5940 = vmatprep.mubr.msk.bf16.mxu1 %vm4557_vm6, %v4594_v57  ;;  %v6440_v57 = vld [vmem:[%s7774_s5 + $0x20] sm:$0xff]  }
 0x17a   : > { %5930 = vmatprep.subr.bf16.mxu1 %v6407_v12  ;;  %6028 = vmatprep.subr.bf16.mxu0 %v6440_v57 }
 0x17b   : > { %6029 = vmatpush3.bf16.msra.mxu0 %v6440_v57 }
 0x17c   : > { %6030 = vmatprep.subr.bf16.mxu0 %v6441_v27 }
 0x17d   : > { %5931 = vmatpush3.bf16.msra.mxu1 %v6407_v12 }
 0x17e   : > { %5932 = vmatprep.subr.bf16.mxu1 %v6408_v45 }
 0x17f   : > { %6031 = vmatpush3.bf16.msra.mxu0 %v6441_v27 }
 0x180   : > { %6032 = vmatprep.subr.bf16.mxu0 %v6442_v33 }
 0x181   : > { %5933 = vmatpush3.bf16.msra.mxu1 %v6408_v45 }
 0x182   : > { %5934 = vmatprep.subr.bf16.mxu1 %v6409_v38 }
 0x183   : > { %6033 = vmatpush3.bf16.msra.mxu0 %v6442_v33  ;;  %v2457_v33 = vld [vmem:[%s7776_s7 + $0x60] sm:$0xff] }
 0x184   : > { %6034 = vmatprep.subr.bf16.mxu0 %v6443_v34 }
 0x185   : > { %5935 = vmatpush3.bf16.msra.mxu1 %v6409_v38 }
 0x186   : > { %5936 = vmatprep.subr.bf16.mxu1 %v6410_v20 }
 0x187   : > { %6035 = vmatpush3.bf16.msra.mxu0 %v6443_v34  ;;  %v2458_v34 = vld [vmem:[%s7776_s7 + $0x68] sm:$0xff] }
 0x189   : > { %5937 = vmatpush3.bf16.msra.mxu1 %v6410_v20 }
 0x18a   : > { %5938 = vmatprep.subr.bf16.mxu1 %v6411_v25 }
 0x18d   : > { %5939 = vmatpush3.bf16.msra.mxu1 %v6411_v25 }
 0x18e   : > { %5948 = vmatprep.subr.bf16.mxu1 %v6412_v8 }
 0x190   : > { %5941 = vmatmul.mubr.msk.bf16.vlgmr.msra.gmra.mrb[16].mxu1 %vm4560_vm10, %v4597_v43  ;;  %v6415_v43 = vld [vmem:[%s7772_s3 + $0x58] sm:$0xff]  }
 0x191   : > { %5944 = vmatprep.mubr.msk.bf16.mxu1 %vm4563_vm11, %v4600_v1  ;;  %5949 = vmatpush3.bf16.msra.mxu1 %v6412_v8  ;;  %v6416_v1 = vld [vmem:[%s7772_s3 + $0x60] sm:$0xff]  }
 0x192   : > { %5950 = vmatprep.subr.bf16.mxu1 %v6413_v46 }
 0x195   : > { %5951 = vmatpush3.bf16.msra.mxu1 %v6413_v46 }
 0x196   : > { %5952 = vmatprep.subr.bf16.mxu1 %v6414_v61 }
 0x198   : > { %5945 = vmatmul.mubr.msk.bf16.gmra.mrb[20].mxu1 %vm4566_vm14, %v4603_v19  ;;  %v6420_v19 = vld [vmem:[%s7772_s3 + $0x80] sm:$0xff]  }
 0x199   : > { %5953 = vmatpush3.bf16.msra.mxu1 %v6414_v61  ;;  %5964 = vmatprep.mubr.bf16.mxu1 %v1805_v39 }
 0x19a   : > { %5954 = vmatprep.subr.bf16.mxu1 %v6415_v43 }
 0x19d   : > { %5955 = vmatpush3.bf16.msra.mxu1 %v6415_v43 }
 0x19e   : > { %5956 = vmatprep.subr.bf16.mxu1 %v6416_v1 }
 0x1a1   : > { %5957 = vmatpush3.bf16.msra.mxu1 %v6416_v1 }
 0x1a2   : > { %5958 = vmatprep.subr.bf16.mxu1 %v6417_v4 }
 0x1a5   : > { %5959 = vmatpush3.bf16.msra.mxu1 %v6417_v4 }
 0x1a6   : > { %5960 = vmatprep.subr.bf16.mxu1 %v6418_v16 }
 0x1a9   : > { %5961 = vmatpush3.bf16.msra.mxu1 %v6418_v16 }
 0x1aa   : > { %5962 = vmatprep.subr.bf16.mxu1 %v6419_v47 }
 0x1ad   : > { %5963 = vmatpush3.bf16.msra.mxu1 %v6419_v47 }
 0x1ae   : > { %5972 = vmatprep.subr.bf16.mxu1 %v6420_v19 }
 0x1b0   : > { %5965 = vmatmul.mubr.bf16.vlgmr.msra.gmra.mrb[16].mxu1 %v6732_v41  ;;  %v6424_v41 = vld [vmem:[%s7772_s3 + $0xa0] sm:$0xff]  }
 0x1b1   : > { %5968 = vmatprep.mubr.bf16.mxu1 %v6760_v26  ;;  %5973 = vmatpush3.bf16.msra.mxu1 %v6420_v19  ;;  %v6425_v26 = vld [vmem:[%s7772_s3 + $0xa8] sm:$0xff]  }
 0x1b2   : > { %5974 = vmatprep.subr.bf16.mxu1 %v6421_v37 }
 0x1b5   : > { %5975 = vmatpush3.bf16.msra.mxu1 %v6421_v37 }
 0x1b6   : > { %5976 = vmatprep.subr.bf16.mxu1 %v6422_v35 }
 0x1b8   : > { %5969 = vmatmul.mubr.bf16.gmra.mrb[20].mxu1 %v6773_v54  ;;  %v6427_v54 = vld [vmem:[%s7772_s3 + $0xb8] sm:$0xff]  }
 0x1b9   : > { %5977 = vmatpush3.bf16.msra.mxu1 %v6422_v35  ;;  %5988 = vmatprep.mubr.bf16.mxu1 %v1955_v23 }
 0x1ba   : > { %5978 = vmatprep.subr.bf16.mxu1 %v6423_v21 }
 0x1bd   : > { %5979 = vmatpush3.bf16.msra.mxu1 %v6423_v21 }
 0x1be   : > { %5980 = vmatprep.subr.bf16.mxu1 %v6424_v41 }
 0x1c1   : > { %5981 = vmatpush3.bf16.msra.mxu1 %v6424_v41 }
 0x1c2   : > { %5982 = vmatprep.subr.bf16.mxu1 %v6425_v26 }
 0x1c5   : > { %5983 = vmatpush3.bf16.msra.mxu1 %v6425_v26  ;;  %v2446_v26 = vld [vmem:[%s7776_s7 + $0x8] sm:$0xff] }
 0x1c6   : > { %5984 = vmatprep.subr.bf16.mxu1 %v6426_v0 }
 0x1c9   : > { %5985 = vmatpush3.bf16.msra.mxu1 %v6426_v0  ;;  %v2447_v0 = vld [vmem:[%s7776_s7 + $0x10] sm:$0xff] }
 0x1ca   : > { %5986 = vmatprep.subr.bf16.mxu1 %v6427_v54 }
 0x1cd   : > { %5987 = vmatpush3.bf16.msra.mxu1 %v6427_v54  ;;  %v2448_v54 = vld [vmem:[%s7776_s7 + $0x18] sm:$0xff] }
 0x1ce   : > { %5996 = vmatprep.subr.bf16.mxu1 %v6428_v6 }
 0x1d0   : > { %5989 = vmatmul.mubr.bf16.vlgmr.msra.gmra.mrb[16].mxu1 %v1956_v22  ;;  %v6434_v22 = vld [vmem:[%s7772_s3 + $0x30] sm:$0xff]  }
 0x1d1   : > { %5992 = vmatprep.mubr.bf16.mxu1 %v1957_v3  ;;  %5997 = vmatpush3.bf16.msra.mxu1 %v6428_v6  ;;  %v2449_v6 = vld [vmem:[%s7776_s7 + $0x20] sm:$0xff] }
 0x1d2   : > { %5998 = vmatprep.subr.bf16.mxu1 %v6429_v49 }
 0x1d5   : > { %5999 = vmatpush3.bf16.msra.mxu1 %v6429_v49  ;;  %v2450_v49 = vld [vmem:[%s7776_s7 + $0x28] sm:$0xff] }
 0x1d6   : > { %6000 = vmatprep.subr.bf16.mxu1 %v6430_v42 }
 0x1d8   : > { %5993 = vmatmul.mubr.bf16.gmra.mrb[20].mxu1 %v1958_v5 }
 0x1d9   : > { %6001 = vmatpush3.bf16.msra.mxu1 %v6430_v42  ;;  %6012 = vmatprep.mubr.msk.bf16.mxu1 %vm4661_vm0, %v6812_v10  ;;  %v2451_v42 = vld [vmem:[%s7776_s7 + $0x30] sm:$0xff] }
 0x1da   : > { %6002 = vmatprep.subr.bf16.mxu1 %v6431_v58 }
 0x1dd   : > { %6003 = vmatpush3.bf16.msra.mxu1 %v6431_v58  ;;  %v2452_v58 = vld [vmem:[%s7776_s7 + $0x38] sm:$0xff] }
 0x1de   : > { %6004 = vmatprep.subr.bf16.mxu1 %v6432_v9 }
 0x1e1   : > { %6005 = vmatpush3.bf16.msra.mxu1 %v6432_v9  ;;  %v2453_v9 = vld [vmem:[%s7776_s7 + $0x40] sm:$0xff] }
 0x1e2   : > { %6006 = vmatprep.subr.bf16.mxu1 %v6433_v15 }
 0x1e5   : > { %6007 = vmatpush3.bf16.msra.mxu1 %v6433_v15  ;;  %v2454_v15 = vld [vmem:[%s7776_s7 + $0x48] sm:$0xff] }
 0x1e6   : > { %6008 = vmatprep.subr.bf16.mxu1 %v6434_v22 }
 0x1e9   : > { %6009 = vmatpush3.bf16.msra.mxu1 %v6434_v22  ;;  %v2455_v22 = vld [vmem:[%s7776_s7 + $0x50] sm:$0xff] }
 0x1ea   : > { %6010 = vmatprep.subr.bf16.mxu1 %v6435_v44 }
 0x1ed   : > { %6011 = vmatpush3.bf16.msra.mxu1 %v6435_v44  ;;  %v2456_v44 = vld [vmem:[%s7776_s7 + $0x58] sm:$0xff] }
 0x1f0   : > { %6013 = vmatmul.mubr.msk.bf16.vlgmr.msra.gmra.mrb[16].mxu1 %vm4664_vm3, %v4665_v62 }
 0x1f1   : > { %6016 = vmatprep.mubr.msk.bf16.mxu1 %vm4667_vm4, %v4668_v13 }
 0x1f8   : > { %6017 = vmatmul.mubr.msk.bf16.gmra.mrb[20].mxu1 %vm4670_vm5, %v4671_v17 }
 0x2c3   : > { %v6014_v36 = vpop.f32.mrb[16].mxu1 }
 0x2c4   : > { %v2255_v50 = vadd.f32 %v6014_v36, %v4673_v29  ;;  %v2207_v14 = vpop.f32.mrb[17].mxu1  ;;  %v2460_v36 = vld [vmem:[%s7776_s7 + $0x78] sm:$0xff] }
 0x2c5   : > { %v2253_v55 = vadd.f32 %v4673_v29, %v2207_v14  ;;  %v6015_v59 = vpop.f32.mrb[18].mxu1  ;;  %v2462_v14 = vld [vmem:[%s7776_s7 + $0x88] sm:$0xff] }
 0x2c6   : > { %v2256_v60 = vadd.f32 %v6015_v59, %v4673_v29  ;;  %v2210_v63 = vpop.f32.mrb[19].mxu1  ;;  %v2263_v3 = vmax.f32 %v2255_v50, 0.0  ;;  %v2461_v50 = vld [vmem:[%s7776_s7 + $0x80] sm:$0xff]  ;;  %v2464_v59 = vld [vmem:[%s7776_s7 + $0x98] sm:$0xff] }
 0x2c7   : > { %v2254_v62 = vadd.f32 %v4673_v29, %v2210_v63  ;;  %v2261_v10 = vmax.f32 %v2253_v55, 0.0  ;;  %v2463_v55 = vld [vmem:[%s7776_s7 + $0x90] sm:$0xff]  ;;  %v2466_v63 = vld [vmem:[%s7776_s7 + $0xa8] sm:$0xff] }
 0x2c8   : > { %v2264_v5 = vmax.f32 %v2256_v60, 0.0  ;;  %v2465_v60 = vld [vmem:[%s7776_s7 + $0xa0] sm:$0xff] }
 0x2c9   : > { %v2262_v13 = vmax.f32 %v2254_v62, 0.0  ;;  %v2467_v62 = vld [vmem:[%s7776_s7 + $0xb0] sm:$0xff] }
 0x2ca   : > { %v2270_v17 = vpack.c.bf16 %v2264_v5, %v2263_v3  ;;  %v2468_v3 = vld [vmem:[%s7776_s7 + $0xb8] sm:$0xff]  ;;  %v2469_v5 = vld [vmem:[%s7776_s7 + $0xc0] sm:$0xff] }
 0x2cb   : > { %v2269_v53 = vpack.c.bf16 %v2262_v13, %v2261_v10  ;;  %v6018_v32 = vpop.f32.mrb[20].mxu1  ;;  %v2470_v10 = vld [vmem:[%s7776_s7 + $0xc8] sm:$0xff]  ;;  %v2471_v13 = vld [vmem:[%s7776_s7 + $0xd0] sm:$0xff] }
 0x2cc   : > { %5428 = vst [vmem:[%s340_s15 + $0x8] sm:$0xff] %v2270_v17   ;;  %v2259_v24 = vadd.f32 %v6018_v32, %v4673_v29  ;;  %v2223_v30 = vpop.f32.mrb[21].mxu1  ;;  %v2474_v32 = vld [vmem:[%s7776_s7 + $0xe8] sm:$0xff] }
 0x2cd   : > { %5092 = vst [vmem:[%s340_s15] sm:$0xff] %v2269_v53   ;;  %v2257_v31 = vadd.f32 %v4673_v29, %v2223_v30  ;;  %v6019_v28 = vpop.f32.mrb[22].mxu1  ;;  %6036 = vmatprep.mubr.bf16.mxu0 %v2269_v53  ;;  %v2473_v53 = vld [vmem:[%s7776_s7 + $0xe0] sm:$0xff]  ;;  %v2476_v30 = vld [vmem:[%s7776_s7 + $0xf8] sm:$0xff] }
 0x2ce   : > { %v2260_v11 = vadd.f32 %v6019_v28, %v4673_v29  ;;  %v2226_v56 = vpop.f32.mrb[23].mxu1  ;;  %6037 = vmatmul.mubr.bf16.vlgmr.msra.gmra.mrb[16].mxu0 %v2270_v17  ;;  %v2267_v2 = vmax.f32 %v2259_v24, 0.0  ;;  %v2472_v17 = vld [vmem:[%s7776_s7 + $0xd8] sm:$0xff]  ;;  %v2475_v24 = vld [vmem:[%s7776_s7 + $0xf0] sm:$0xff]  ;;  %v2478_v28 = vld [vmem:[%s7776_s7 + $0x108] sm:$0xff] }
 0x2cf   : > { %v2258_v18 = vadd.f32 %v4673_v29, %v2226_v56  ;;  %v2265_v12 = vmax.f32 %v2257_v31, 0.0  ;;  %v2459_v29 = vld [vmem:[%s7776_s7 + $0x70] sm:$0xff]  ;;  %v2477_v31 = vld [vmem:[%s7776_s7 + $0x100] sm:$0xff]  ;;  %v2480_v56 = vld [vmem:[%s7776_s7 + $0x118] sm:$0xff] }
 0x2d0   : > { %v2268_v7 = vmax.f32 %v2260_v11, 0.0  ;;  %v2479_v11 = vld [vmem:[%s7776_s7 + $0x110] sm:$0xff] }
 0x2d1   : > { %v2266_v40 = vmax.f32 %v2258_v18, 0.0  ;;  %v2481_v18 = vld [vmem:[%s7776_s7 + $0x120] sm:$0xff] }
 0x2d2   : > { %v2272_v52 = vpack.c.bf16 %v2268_v7, %v2267_v2  ;;  %v2482_v2 = vld [vmem:[%s7776_s7 + $0x128] sm:$0xff]  ;;  %v2483_v7 = vld [vmem:[%s7776_s7 + $0x130] sm:$0xff] }
 0x2d3   : > { %v2271_v45 = vpack.c.bf16 %v2266_v40, %v2265_v12  ;;  %v2484_v12 = vld [vmem:[%s7776_s7 + $0x138] sm:$0xff]  ;;  %v2485_v40 = vld [vmem:[%s7776_s7 + $0x140] sm:$0xff] }
 0x2d4   : > { %5430 = vst [vmem:[%s340_s15 + $0x18] sm:$0xff] %v2272_v52  }
 0x2d5   : > { %5429 = vst [vmem:[%s340_s15 + $0x10] sm:$0xff] %v2271_v45   ;;  %6040 = vmatprep.mubr.bf16.mxu0 %v2271_v45  ;;  %v2487_v45 = vld [vmem:[%s7776_s7 + $0x150] sm:$0xff] }
 0x2d6   : > { %6041 = vmatmul.mubr.bf16.gmra.mrb[20].mxu0 %v2272_v52  ;;  %v2486_v52 = vld [vmem:[%s7776_s7 + $0x148] sm:$0xff] }
 0x2d7   : > { %6060 = vmatprep.mubr.msk.f32.mxu0 %vm2573_vm1, %v2445_v51  ;;  %v2488_v51 = vld [vmem:[%s7776_s7 + $0x158] sm:$0xff] }
 0x3a1   : > { %v6038_v38 = vpop.f32.mrb[16].mxu0 }
 0x3a2   : > { %v2414_v20 = vpop.f32.mrb[17].mxu0  ;;  %v2423_v25 = vadd.f32 %v6038_v38, %v4682_v48  ;;  %v2489_v38 = vld [vmem:[%s7776_s7 + $0x160] sm:$0xff] }
 0x3a3   : > { %v6039_v57 = vpop.f32.mrb[18].mxu0  ;;  %v2415_v46 = vadd.f32 %v4682_v48, %v2414_v20  ;;  %v2491_v20 = vld [vmem:[%s7776_s7 + $0x170] sm:$0xff] }
 0x3a4   : > { %v2426_v27 = vadd.f32 %v6039_v57, %v4682_v48  ;;  %v2417_v8 = vpop.f32.mrb[19].mxu0  ;;  %v2492_v57 = vld [vmem:[%s7776_s7 + $0x178] sm:$0xff] }
 0x3a5   : > { %v2418_v61 = vadd.f32 %v4682_v48, %v2417_v8  ;;  %v2495_v8 = vld [vmem:[%s7776_s7 + $0x190] sm:$0xff] }
 0x3a6   : > { %v6256_v43 = vpack.c.bf16 %v2426_v27, %v2423_v25  ;;  %v2493_v25 = vld [vmem:[%s7776_s7 + $0x180] sm:$0xff]  ;;  %v2494_v27 = vld [vmem:[%s7776_s7 + $0x188] sm:$0xff] }
 0x3a7   : > { %v6252_v39 = vpack.c.bf16 %v2418_v61, %v2415_v46  ;;  %v2496_v46 = vld [vmem:[%s7776_s7 + $0x198] sm:$0xff]  ;;  %v2497_v61 = vld [vmem:[%s7776_s7 + $0x1a0] sm:$0xff] }
 0x3a9   : > { %v6042_v1 = vpop.f32.mrb[20].mxu0  ;;  %6253 = vmatprep.subr.bf16.mxu0 %v6252_v39 }
 0x3aa   : > { %v2430_v4 = vpop.f32.mrb[21].mxu0  ;;  %6255 = vmatpush3.bf16.msra.mxu0 %v6252_v39  ;;  %v2439_v47 = vadd.f32 %v6042_v1, %v4682_v48  ;;  %v2499_v39 = vld [vmem:[%s7776_s7 + $0x1b0] sm:$0xff]  ;;  %v2500_v1 = vld [vmem:[%s7776_s7 + $0x1b8] sm:$0xff] }
 0x3ab   : > { %v6043_v16 = vpop.f32.mrb[22].mxu0  ;;  %6257 = vmatprep.subr.bf16.mxu0 %v6256_v43  ;;  %v2431_v35 = vadd.f32 %v4682_v48, %v2430_v4  ;;  %v2501_v4 = vld [vmem:[%s7776_s7 + $0x1c0] sm:$0xff] }
 0x3ac   : > { %v2442_v19 = vadd.f32 %v6043_v16, %v4682_v48  ;;  %v2433_v37 = vpop.f32.mrb[23].mxu0  ;;  %v2502_v16 = vld [vmem:[%s7776_s7 + $0x1c8] sm:$0xff] }
 0x3ad   : > { %v2434_v21 = vadd.f32 %v4682_v48, %v2433_v37  ;;  %v2490_v48 = vld [vmem:[%s7776_s7 + $0x168] sm:$0xff]  ;;  %v2505_v37 = vld [vmem:[%s7776_s7 + $0x1e0] sm:$0xff] }
 0x3ae   : > { %v6264_v23 = vpack.c.bf16 %v2442_v19, %v2439_v47  ;;  %6259 = vmatpush3.bf16.msra.mxu0 %v6256_v43  ;;  %v2498_v43 = vld [vmem:[%s7776_s7 + $0x1a8] sm:$0xff]  ;;  %v2503_v47 = vld [vmem:[%s7776_s7 + $0x1d0] sm:$0xff]  ;;  %v2504_v19 = vld [vmem:[%s7776_s7 + $0x1d8] sm:$0xff] }
 0x3af   : > { %v6260_v41 = vpack.c.bf16 %v2434_v21, %v2431_v35  ;;  %v2506_v35 = vld [vmem:[%s7776_s7 + $0x1e8] sm:$0xff]  ;;  %v2507_v21 = vld [vmem:[%s7776_s7 + $0x1f0] sm:$0xff] }
 0x3b1   : > { %6261 = vmatprep.subr.bf16.mxu0 %v6260_v41 }
 0x3b2   : > { %6263 = vmatpush3.bf16.msra.mxu0 %v6260_v41  ;;  %v2509_v41 = vld [vmem:[%s7776_s7 + $0x200] sm:$0xff] }
 0x3b3   : > { %6265 = vmatprep.subr.bf16.mxu0 %v6264_v23 }
 0x3b6   : > { %6267 = vmatpush3.bf16.msra.mxu0 %v6264_v23  ;;  %v2508_v23 = vld [vmem:[%s7776_s7 + $0x1f8] sm:$0xff] }
 0x3b9   : > { %6061 = vmatmul.mubr.msk.f32.vlgmr.msra.gmra.mrb[24].mxu0 %vm2573_vm1, %v2446_v26  ;;  %v2510_v26 = vld [vmem:[%s7776_s7 + $0x208] sm:$0xff] }
 0x3ba   : > { %6063 = vmatprep.mubr.msk.f32.mxu0 %vm2573_vm1, %v2447_v0  ;;  %v2511_v0 = vld [vmem:[%s7776_s7 + $0x210] sm:$0xff] }
 0x3bd   : > { %6064 = vmatmul.mubr.msk.f32.gmra.mrb[26].mxu0 %vm2573_vm1, %v2448_v54  ;;  %v2512_v54 = vld [vmem:[%s7776_s7 + $0x218] sm:$0xff] }
 0x3be   : > { %6066 = vmatprep.mubr.msk.f32.mxu0 %vm2573_vm1, %v2449_v6  ;;  %v2513_v6 = vld [vmem:[%s7776_s7 + $0x220] sm:$0xff] }
 0x3c1   : > { %6067 = vmatmul.mubr.msk.f32.gmra.mrb[28].mxu0 %vm2573_vm1, %v2450_v49  ;;  %v2514_v49 = vld [vmem:[%s7776_s7 + $0x228] sm:$0xff] }
 0x3c2   : > { %6069 = vmatprep.mubr.msk.f32.mxu0 %vm2573_vm1, %v2451_v42  ;;  %v2515_v42 = vld [vmem:[%s7776_s7 + $0x230] sm:$0xff] }
 0x3c5   : > { %6070 = vmatmul.mubr.msk.f32.gmra.mrb[30].mxu0 %vm2573_vm1, %v2452_v58  ;;  %v2516_v58 = vld [vmem:[%s7776_s7 + $0x238] sm:$0xff] }
 0x3c6   : > { %6072 = vmatprep.mubr.msk.f32.mxu0 %vm2573_vm1, %v2453_v9  ;;  %v2517_v9 = vld [vmem:[%s7776_s7 + $0x240] sm:$0xff] }
 0x3c9   : > { %6073 = vmatmul.mubr.msk.f32.gmra.mrb[32].mxu0 %vm2573_vm1, %v2454_v15  ;;  %v2518_v15 = vld [vmem:[%s7776_s7 + $0x248] sm:$0xff] }
 0x3ca   : > { %6075 = vmatprep.mubr.msk.f32.mxu0 %vm2573_vm1, %v2455_v22  ;;  %v2519_v22 = vld [vmem:[%s7776_s7 + $0x250] sm:$0xff] }
 0x3cd   : > { %6076 = vmatmul.mubr.msk.f32.gmra.mrb[34].mxu0 %vm2573_vm1, %v2456_v44  ;;  %v2520_v44 = vld [vmem:[%s7776_s7 + $0x258] sm:$0xff] }
 0x3ce   : > { %6078 = vmatprep.mubr.msk.f32.mxu0 %vm2573_vm1, %v2457_v33  ;;  %v2521_v33 = vld [vmem:[%s7776_s7 + $0x260] sm:$0xff] }
 0x3d1   : > { %6079 = vmatmul.mubr.msk.f32.gmra.mrb[36].mxu0 %vm2573_vm1, %v2458_v34  ;;  %v2522_v34 = vld [vmem:[%s7776_s7 + $0x268] sm:$0xff] }
 0x3d2   : > { %6081 = vmatprep.mubr.msk.f32.mxu0 %vm2573_vm1, %v2459_v29  ;;  %v2523_v29 = vld [vmem:[%s7776_s7 + $0x270] sm:$0xff] }
 0x3d5   : > { %6082 = vmatmul.mubr.msk.f32.gmra.mrb[38].mxu0 %vm2573_vm1, %v2460_v36  ;;  %v2524_v36 = vld [vmem:[%s7776_s7 + $0x278] sm:$0xff] }
 0x3d6   : > { %6084 = vmatprep.mubr.msk.f32.mxu0 %vm2573_vm1, %v2461_v50  ;;  %v2525_v50 = vld [vmem:[%s7776_s7 + $0x280] sm:$0xff] }
 0x3d9   : > { %6085 = vmatmul.mubr.msk.f32.gmra.mrb[40].mxu0 %vm2573_vm1, %v2462_v14  ;;  %v2526_v14 = vld [vmem:[%s7776_s7 + $0x288] sm:$0xff] }
 0x3da   : > { %6087 = vmatprep.mubr.msk.f32.mxu0 %vm2573_vm1, %v2463_v55  ;;  %v2527_v55 = vld [vmem:[%s7776_s7 + $0x290] sm:$0xff] }
 0x3dd   : > { %6088 = vmatmul.mubr.msk.f32.gmra.mrb[42].mxu0 %vm2573_vm1, %v2464_v59  ;;  %v2528_v59 = vld [vmem:[%s7776_s7 + $0x298] sm:$0xff] }
 0x3de   : > { %6090 = vmatprep.mubr.msk.f32.mxu0 %vm2573_vm1, %v2465_v60  ;;  %v2529_v60 = vld [vmem:[%s7776_s7 + $0x2a0] sm:$0xff] }
 0x3e1   : > { %6091 = vmatmul.mubr.msk.f32.gmra.mrb[44].mxu0 %vm2573_vm1, %v2466_v63  ;;  %v2530_v63 = vld [vmem:[%s7776_s7 + $0x2a8] sm:$0xff] }
 0x3e2   : > { %6093 = vmatprep.mubr.msk.f32.mxu0 %vm2573_vm1, %v2467_v62  ;;  %v2531_v62 = vld [vmem:[%s7776_s7 + $0x2b0] sm:$0xff] }
 0x3e5   : > { %6094 = vmatmul.mubr.msk.f32.gmra.mrb[46].mxu0 %vm2573_vm1, %v2468_v3  ;;  %v2532_v3 = vld [vmem:[%s7776_s7 + $0x2b8] sm:$0xff] }
 0x3e6   : > { %6096 = vmatprep.mubr.msk.f32.mxu0 %vm2573_vm1, %v2469_v5  ;;  %v2533_v5 = vld [vmem:[%s7776_s7 + $0x2c0] sm:$0xff] }
 0x3e9   : > { %6097 = vmatmul.mubr.msk.f32.gmra.mrb[48].mxu0 %vm2573_vm1, %v2470_v10  ;;  %v2534_v10 = vld [vmem:[%s7776_s7 + $0x2c8] sm:$0xff] }
 0x3ea   : > { %6099 = vmatprep.mubr.msk.f32.mxu0 %vm2573_vm1, %v2471_v13  ;;  %v2535_v13 = vld [vmem:[%s7776_s7 + $0x2d0] sm:$0xff] }
 0x3ed   : > { %6100 = vmatmul.mubr.msk.f32.gmra.mrb[50].mxu0 %vm2573_vm1, %v2472_v17  ;;  %v2536_v17 = vld [vmem:[%s7776_s7 + $0x2d8] sm:$0xff] }
 0x3ee   : > { %6102 = vmatprep.mubr.msk.f32.mxu0 %vm2573_vm1, %v2473_v53  ;;  %v2537_v53 = vld [vmem:[%s7776_s7 + $0x2e0] sm:$0xff] }
 0x3f1   : > { %6103 = vmatmul.mubr.msk.f32.gmra.mrb[52].mxu0 %vm2573_vm1, %v2474_v32  ;;  %v2538_v32 = vld [vmem:[%s7776_s7 + $0x2e8] sm:$0xff] }
 0x3f2   : > { %6105 = vmatprep.mubr.msk.f32.mxu0 %vm2573_vm1, %v2475_v24  ;;  %v2539_v24 = vld [vmem:[%s7776_s7 + $0x2f0] sm:$0xff] }
 0x3f5   : > { %6106 = vmatmul.mubr.msk.f32.gmra.mrb[54].mxu0 %vm2573_vm1, %v2476_v30  ;;  %v2540_v30 = vld [vmem:[%s7776_s7 + $0x2f8] sm:$0xff] }
 0x3f6   : > { %6108 = vmatprep.mubr.msk.f32.mxu0 %vm2573_vm1, %v2477_v31  ;;  %v2541_v31 = vld [vmem:[%s7776_s7 + $0x300] sm:$0xff] }
 0x3f9   : > { %6109 = vmatmul.mubr.msk.f32.gmra.mrb[56].mxu0 %vm2573_vm1, %v2478_v28  ;;  %v2542_v28 = vld [vmem:[%s7776_s7 + $0x308] sm:$0xff] }
 0x3fa   : > { %6111 = vmatprep.mubr.msk.f32.mxu0 %vm2573_vm1, %v2479_v11  ;;  %v2543_v11 = vld [vmem:[%s7776_s7 + $0x310] sm:$0xff] }
 0x3fd   : > { %6112 = vmatmul.mubr.msk.f32.gmra.mrb[58].mxu0 %vm2573_vm1, %v2480_v56  ;;  %v2544_v56 = vld [vmem:[%s7776_s7 + $0x318] sm:$0xff] }
 0x3fe   : > { %6114 = vmatprep.mubr.msk.f32.mxu0 %vm2573_vm1, %v2481_v18  ;;  %v2545_v18 = vld [vmem:[%s7776_s7 + $0x320] sm:$0xff] }
 0x401   : > { %6115 = vmatmul.mubr.msk.f32.gmra.mrb[60].mxu0 %vm2573_vm1, %v2482_v2  ;;  %v2546_v2 = vld [vmem:[%s7776_s7 + $0x328] sm:$0xff] }
 0x402   : > { %6117 = vmatprep.mubr.msk.f32.mxu0 %vm2573_vm1, %v2483_v7  ;;  %v2547_v7 = vld [vmem:[%s7776_s7 + $0x330] sm:$0xff] }
 0x405   : > { %6118 = vmatmul.mubr.msk.f32.gmra.mrb[62].mxu0 %vm2573_vm1, %v2484_v12  ;;  %v2548_v12 = vld [vmem:[%s7776_s7 + $0x338] sm:$0xff] }
 0x406   : > { %6120 = vmatprep.mubr.msk.f32.mxu0 %vm2573_vm1, %v2485_v40  ;;  %v2549_v40 = vld [vmem:[%s7776_s7 + $0x340] sm:$0xff] }
 0x409   : > { %6121 = vmatmul.mubr.msk.f32.gmra.mrb[64].mxu0 %vm2573_vm1, %v2486_v52  ;;  %v2550_v52 = vld [vmem:[%s7776_s7 + $0x348] sm:$0xff] }
 0x40a   : > { %6123 = vmatprep.mubr.msk.f32.mxu0 %vm2573_vm1, %v2487_v45  ;;  %v2551_v45 = vld [vmem:[%s7776_s7 + $0x350] sm:$0xff] }
 0x40d   : > { %6124 = vmatmul.mubr.msk.f32.gmra.mrb[66].mxu0 %vm2573_vm1, %v2488_v51  ;;  %v2552_v51 = vld [vmem:[%s7776_s7 + $0x358] sm:$0xff] }
 0x40e   : > { %6126 = vmatprep.mubr.msk.f32.mxu0 %vm2573_vm1, %v2489_v38  ;;  %v2553_v38 = vld [vmem:[%s7776_s7 + $0x360] sm:$0xff] }
 0x411   : > { %6127 = vmatmul.mubr.msk.f32.gmra.mrb[68].mxu0 %vm2573_vm1, %v2490_v48 }
 0x412   : > { %6129 = vmatprep.mubr.msk.f32.mxu0 %vm2573_vm1, %v2491_v20 }
 0x415   : > { %6130 = vmatmul.mubr.msk.f32.gmra.mrb[70].mxu0 %vm2573_vm1, %v2492_v57 }
 0x416   : > { %6132 = vmatprep.mubr.msk.f32.mxu0 %vm2573_vm1, %v2493_v25  ;;  %v2554_v25 = vld [vmem:[%s7776_s7 + $0x368] sm:$0xff] }
 0x419   : > { %6133 = vmatmul.mubr.msk.f32.gmra.mrb[72].mxu0 %vm2573_vm1, %v2494_v27  ;;  %v2555_v27 = vld [vmem:[%s7776_s7 + $0x370] sm:$0xff] }
 0x41a   : > { %6135 = vmatprep.mubr.msk.f32.mxu0 %vm2573_vm1, %v2495_v8 }
 0x41d   : > { %6136 = vmatmul.mubr.msk.f32.gmra.mrb[74].mxu0 %vm2573_vm1, %v2496_v46 }
 0x41e   : > { %6138 = vmatprep.mubr.msk.f32.mxu0 %vm2573_vm1, %v2497_v61 }
 0x421   : > { %6139 = vmatmul.mubr.msk.f32.gmra.mrb[76].mxu0 %vm2573_vm1, %v2498_v43  ;;  %v2556_v43 = vld [vmem:[%s7776_s7 + $0x378] sm:$0xff] }
 0x422   : > { %6141 = vmatprep.mubr.msk.f32.mxu0 %vm2573_vm1, %v2499_v39  ;;  %v2557_v39 = vld [vmem:[%s7776_s7 + $0x380] sm:$0xff] }
 0x425   : > { %6142 = vmatmul.mubr.msk.f32.gmra.mrb[78].mxu0 %vm2573_vm1, %v2500_v1 }
 0x426   : > { %6144 = vmatprep.mubr.msk.f32.mxu0 %vm2573_vm1, %v2501_v4 }
 0x429   : > { %6145 = vmatmul.mubr.msk.f32.gmra.mrb[80].mxu0 %vm2573_vm1, %v2502_v16 }
 0x42a   : > { %6147 = vmatprep.mubr.msk.f32.mxu0 %vm2573_vm1, %v2503_v47  ;;  %v2558_v47 = vld [vmem:[%s7776_s7 + $0x388] sm:$0xff] }
 0x42d   : > { %6148 = vmatmul.mubr.msk.f32.gmra.mrb[82].mxu0 %vm2573_vm1, %v2504_v19  ;;  %v2559_v19 = vld [vmem:[%s7776_s7 + $0x390] sm:$0xff] }
 0x42e   : > { %6150 = vmatprep.mubr.msk.f32.mxu0 %vm2573_vm1, %v2505_v37 }
 0x431   : > { %6151 = vmatmul.mubr.msk.f32.gmra.mrb[84].mxu0 %vm2573_vm1, %v2506_v35 }
 0x432   : > { %6153 = vmatprep.mubr.msk.f32.mxu0 %vm2573_vm1, %v2507_v21 }
 0x435   : > { %6154 = vmatmul.mubr.msk.f32.gmra.mrb[86].mxu0 %vm2573_vm1, %v2508_v23  ;;  %v2560_v23 = vld [vmem:[%s7776_s7 + $0x398] sm:$0xff] }
 0x436   : > { %6156 = vmatprep.mubr.msk.f32.mxu0 %vm2573_vm1, %v2509_v41  ;;  %v2561_v41 = vld [vmem:[%s7776_s7 + $0x3a0] sm:$0xff] }
 0x439   : > { %6157 = vmatmul.mubr.msk.f32.gmra.mrb[88].mxu0 %vm2573_vm1, %v2510_v26 }
 0x43a   : > { %6159 = vmatprep.mubr.msk.f32.mxu0 %vm2573_vm1, %v2511_v0 }
 0x43d   : > { %6160 = vmatmul.mubr.msk.f32.gmra.mrb[90].mxu0 %vm2573_vm1, %v2512_v54 }
 0x43e   : > { %6162 = vmatprep.mubr.msk.f32.mxu0 %vm2573_vm1, %v2513_v6  ;;  %v2562_v6 = vld [vmem:[%s7776_s7 + $0x3a8] sm:$0xff] }
 0x441   : > { %6163 = vmatmul.mubr.msk.f32.gmra.mrb[92].mxu0 %vm2573_vm1, %v2514_v49  ;;  %v2563_v49 = vld [vmem:[%s7776_s7 + $0x3b0] sm:$0xff] }
 0x442   : > { %6165 = vmatprep.mubr.msk.f32.mxu0 %vm2573_vm1, %v2515_v42 }
 0x445   : > { %6166 = vmatmul.mubr.msk.f32.gmra.mrb[94].mxu0 %vm2573_vm1, %v2516_v58 }
 0x446   : > { %6168 = vmatprep.mubr.msk.f32.mxu0 %vm2573_vm1, %v2517_v9 }
 0x449   : > { %6169 = vmatmul.mubr.msk.f32.gmra.mrb[96].mxu0 %vm2573_vm1, %v2518_v15  ;;  %v2564_v15 = vld [vmem:[%s7776_s7 + $0x3b8] sm:$0xff] }
 0x44a   : > { %6171 = vmatprep.mubr.msk.f32.mxu0 %vm2573_vm1, %v2519_v22  ;;  %v2565_v22 = vld [vmem:[%s7776_s7 + $0x3c0] sm:$0xff] }
 0x44d   : > { %6172 = vmatmul.mubr.msk.f32.gmra.mrb[98].mxu0 %vm2573_vm1, %v2520_v44 }
 0x44e   : > { %6174 = vmatprep.mubr.msk.f32.mxu0 %vm2573_vm1, %v2521_v33 }
 0x451   : > { %6175 = vmatmul.mubr.msk.f32.gmra.mrb[100].mxu0 %vm2573_vm1, %v2522_v34 }
 0x452   : > { %6177 = vmatprep.mubr.msk.f32.mxu0 %vm2573_vm1, %v2523_v29  ;;  %v2566_v29 = vld [vmem:[%s7776_s7 + $0x3c8] sm:$0xff] }
 0x455   : > { %6178 = vmatmul.mubr.msk.f32.gmra.mrb[102].mxu0 %vm2573_vm1, %v2524_v36  ;;  %v2567_v36 = vld [vmem:[%s7776_s7 + $0x3d0] sm:$0xff] }
 0x456   : > { %6180 = vmatprep.mubr.msk.f32.mxu0 %vm2573_vm1, %v2525_v50 }
 0x459   : > { %6181 = vmatmul.mubr.msk.f32.gmra.mrb[104].mxu0 %vm2573_vm1, %v2526_v14 }
 0x45a   : > { %6183 = vmatprep.mubr.msk.f32.mxu0 %vm2573_vm1, %v2527_v55 }
 0x45d   : > { %6184 = vmatmul.mubr.msk.f32.gmra.mrb[106].mxu0 %vm2573_vm1, %v2528_v59  ;;  %v2568_v59 = vld [vmem:[%s7776_s7 + $0x3d8] sm:$0xff] }
 0x45e   : > { %6186 = vmatprep.mubr.msk.f32.mxu0 %vm2573_vm1, %v2529_v60  ;;  %v2569_v60 = vld [vmem:[%s7776_s7 + $0x3e0] sm:$0xff] }
 0x461   : > { %6187 = vmatmul.mubr.msk.f32.gmra.mrb[108].mxu0 %vm2573_vm1, %v2530_v63 }
 0x462   : > { %6189 = vmatprep.mubr.msk.f32.mxu0 %vm2573_vm1, %v2531_v62 }
 0x465   : > { %6190 = vmatmul.mubr.msk.f32.gmra.mrb[110].mxu0 %vm2573_vm1, %v2532_v3 }
 0x466   : > { %6192 = vmatprep.mubr.msk.f32.mxu0 %vm2573_vm1, %v2533_v5  ;;  %v2570_v5 = vld [vmem:[%s7776_s7 + $0x3e8] sm:$0xff] }
 0x469   : > { %6193 = vmatmul.mubr.msk.f32.gmra.mrb[112].mxu0 %vm2573_vm1, %v2534_v10  ;;  %v2571_v10 = vld [vmem:[%s7776_s7 + $0x3f0] sm:$0xff] }
 0x46a   : > { %6195 = vmatprep.mubr.msk.f32.mxu0 %vm2573_vm1, %v2535_v13 }
 0x46d   : > { %6196 = vmatmul.mubr.msk.f32.gmra.mrb[114].mxu0 %vm2573_vm1, %v2536_v17 }
 0x46e   : > { %6198 = vmatprep.mubr.msk.f32.mxu0 %vm2573_vm1, %v2537_v53 }
 0x471   : > { %6199 = vmatmul.mubr.msk.f32.gmra.mrb[116].mxu0 %vm2573_vm1, %v2538_v32  ;;  %v2572_v32 = vld [vmem:[%s7776_s7 + $0x3f8] sm:$0xff] }
 0x472   : > { %6201 = vmatprep.mubr.msk.f32.mxu0 %vm2573_vm1, %v2539_v24 }
 0x475   : > { %6202 = vmatmul.mubr.msk.f32.gmra.mrb[118].mxu0 %vm2573_vm1, %v2540_v30 }
 0x476   : > { %6204 = vmatprep.mubr.msk.f32.mxu0 %vm2573_vm1, %v2541_v31 }
 0x479   : > { %6205 = vmatmul.mubr.msk.f32.gmra.mrb[120].mxu0 %vm2573_vm1, %v2542_v28 }
 0x47a   : > { %6207 = vmatprep.mubr.msk.f32.mxu0 %vm2573_vm1, %v2543_v11 }
 0x47d   : > { %6208 = vmatmul.mubr.msk.f32.gmra.mrb[122].mxu0 %vm2573_vm1, %v2544_v56 }
 0x47e   : > { %6210 = vmatprep.mubr.msk.f32.mxu0 %vm2573_vm1, %v2545_v18 }
 0x481   : > { %6211 = vmatmul.mubr.msk.f32.gmra.mrb[124].mxu0 %vm2573_vm1, %v2546_v2 }
 0x482   : > { %6213 = vmatprep.mubr.msk.f32.mxu0 %vm2573_vm1, %v2547_v7 }
 0x485   : > { %6214 = vmatmul.mubr.msk.f32.gmra.mrb[126].mxu0 %vm2573_vm1, %v2548_v12 }
 0x486   : > { %6216 = vmatprep.mubr.msk.f32.mxu0 %vm2573_vm1, %v2549_v40 }
 0x489   : > { %6217 = vmatmul.mubr.msk.f32.gmra.mrb[128].mxu0 %vm2573_vm1, %v2550_v52 }
 0x48a   : > { %6219 = vmatprep.mubr.msk.f32.mxu0 %vm2573_vm1, %v2551_v45 }
 0x48c   : > { %v6062_v48 = vpop.f32.mrb[24].mxu0 }
 0x48d   : > { %v3024_v20 = vpop.f32.mrb[25].mxu0  ;;  %6220 = vmatmul.mubr.msk.f32.gmra.mrb[130].mxu0 %vm2573_vm1, %v2552_v51 }
 0x48e   : > { %v5111_v57 = vpack.c.bf16 %v6062_v48, %v3024_v20  ;;  %6222 = vmatprep.mubr.msk.f32.mxu0 %vm2573_vm1, %v2553_v38 }
 0x490   : > { %5112 = vst [vmem:[%s7622_s11] sm:$0xff] %v5111_v57   ;;  %v6065_v8 = vpop.f32.mrb[26].mxu0 }
 0x491   : > { %v3034_v46 = vpop.f32.mrb[27].mxu0  ;;  %6223 = vmatmul.mubr.msk.f32.gmra.mrb[132].mxu0 %vm2573_vm1, %v2554_v25 }
 0x492   : > { %v5116_v61 = vpack.c.bf16 %v6065_v8, %v3034_v46  ;;  %6225 = vmatprep.mubr.msk.f32.mxu0 %vm2573_vm1, %v2555_v27 }
 0x494   : > { %5431 = vst [vmem:[%s7622_s11 + $0x8] sm:$0xff] %v5116_v61   ;;  %v6068_v1 = vpop.f32.mrb[28].mxu0 }
 0x495   : > { %v3044_v4 = vpop.f32.mrb[29].mxu0  ;;  %6226 = vmatmul.mubr.msk.f32.gmra.mrb[134].mxu0 %vm2573_vm1, %v2556_v43 }
 0x496   : > { %v5121_v16 = vpack.c.bf16 %v6068_v1, %v3044_v4  ;;  %6228 = vmatprep.mubr.msk.f32.mxu0 %vm2573_vm1, %v2557_v39 }
 0x498   : > { %5432 = vst [vmem:[%s7622_s11 + $0x10] sm:$0xff] %v5121_v16   ;;  %v6071_v37 = vpop.f32.mrb[30].mxu0 }
 0x499   : > { %v3054_v35 = vpop.f32.mrb[31].mxu0  ;;  %6229 = vmatmul.mubr.msk.f32.gmra.mrb[136].mxu0 %vm2573_vm1, %v2558_v47 }
 0x49a   : > { %v5126_v21 = vpack.c.bf16 %v6071_v37, %v3054_v35  ;;  %6231 = vmatprep.mubr.msk.f32.mxu0 %vm2573_vm1, %v2559_v19 }
 0x49c   : > { %5433 = vst [vmem:[%s7622_s11 + $0x18] sm:$0xff] %v5126_v21   ;;  %v6074_v26 = vpop.f32.mrb[32].mxu0 }
 0x49d   : > { %v3064_v0 = vpop.f32.mrb[33].mxu0  ;;  %6232 = vmatmul.mubr.msk.f32.gmra.mrb[138].mxu0 %vm2573_vm1, %v2560_v23 }
 0x49e   : > { %v5131_v54 = vpack.c.bf16 %v6074_v26, %v3064_v0  ;;  %6234 = vmatprep.mubr.msk.f32.mxu0 %vm2573_vm1, %v2561_v41 }
 0x4a0   : > { %5434 = vst [vmem:[%s7622_s11 + $0x20] sm:$0xff] %v5131_v54   ;;  %v6077_v42 = vpop.f32.mrb[34].mxu0 }
 0x4a1   : > { %v3074_v58 = vpop.f32.mrb[35].mxu0  ;;  %6235 = vmatmul.mubr.msk.f32.gmra.mrb[140].mxu0 %vm2573_vm1, %v2562_v6 }
 0x4a2   : > { %v5136_v9 = vpack.c.bf16 %v6077_v42, %v3074_v58  ;;  %6237 = vmatprep.mubr.msk.f32.mxu0 %vm2573_vm1, %v2563_v49 }
 0x4a4   : > { %5435 = vst [vmem:[%s7622_s11 + $0x28] sm:$0xff] %v5136_v9   ;;  %v6080_v44 = vpop.f32.mrb[36].mxu0 }
 0x4a5   : > { %v3084_v33 = vpop.f32.mrb[37].mxu0  ;;  %6238 = vmatmul.mubr.msk.f32.gmra.mrb[142].mxu0 %vm2573_vm1, %v2564_v15 }
 0x4a6   : > { %v5141_v34 = vpack.c.bf16 %v6080_v44, %v3084_v33  ;;  %6240 = vmatprep.mubr.msk.f32.mxu0 %vm2573_vm1, %v2565_v22 }
 0x4a8   : > { %5436 = vst [vmem:[%s7622_s11 + $0x30] sm:$0xff] %v5141_v34   ;;  %v6083_v50 = vpop.f32.mrb[38].mxu0 }
 0x4a9   : > { %v3094_v14 = vpop.f32.mrb[39].mxu0  ;;  %6241 = vmatmul.mubr.msk.f32.gmra.mrb[144].mxu0 %vm2573_vm1, %v2566_v29 }
 0x4aa   : > { %v5146_v55 = vpack.c.bf16 %v6083_v50, %v3094_v14  ;;  %6243 = vmatprep.mubr.msk.f32.mxu0 %vm2573_vm1, %v2567_v36 }
 0x4ac   : > { %5437 = vst [vmem:[%s7622_s11 + $0x38] sm:$0xff] %v5146_v55   ;;  %v6086_v63 = vpop.f32.mrb[40].mxu0 }
 0x4ad   : > { %v3104_v62 = vpop.f32.mrb[41].mxu0  ;;  %6244 = vmatmul.mubr.msk.f32.gmra.mrb[146].mxu0 %vm2573_vm1, %v2568_v59 }
 0x4ae   : > { %v5151_v3 = vpack.c.bf16 %v6086_v63, %v3104_v62  ;;  %6246 = vmatprep.mubr.msk.f32.mxu0 %vm2573_vm1, %v2569_v60 }
 0x4b0   : > { %5438 = vst [vmem:[%s7622_s11 + $0x40] sm:$0xff] %v5151_v3   ;;  %v6089_v13 = vpop.f32.mrb[42].mxu0 }
 0x4b1   : > { %v3114_v17 = vpop.f32.mrb[43].mxu0  ;;  %6247 = vmatmul.mubr.msk.f32.gmra.mrb[148].mxu0 %vm2573_vm1, %v2570_v5 }
 0x4b2   : > { %v5156_v53 = vpack.c.bf16 %v6089_v13, %v3114_v17  ;;  %6249 = vmatprep.mubr.msk.f32.mxu0 %vm2573_vm1, %v2571_v10 }
 0x4b4   : > { %5439 = vst [vmem:[%s7622_s11 + $0x48] sm:$0xff] %v5156_v53   ;;  %v6092_v24 = vpop.f32.mrb[44].mxu0 }
 0x4b5   : > { %v3124_v30 = vpop.f32.mrb[45].mxu0  ;;  %6250 = vmatmul.mubr.msk.f32.gmra.mrb[150].mxu0 %vm2573_vm1, %v2572_v32 }
 0x4b6   : > { %v5161_v31 = vpack.c.bf16 %v6092_v24, %v3124_v30 }
 0x4b8   : > { %5440 = vst [vmem:[%s7622_s11 + $0x50] sm:$0xff] %v5161_v31   ;;  %v6095_v28 = vpop.f32.mrb[46].mxu0 }
 0x4b9   : > { %v3134_v11 = vpop.f32.mrb[47].mxu0 }
 0x4ba   : > { %v5166_v56 = vpack.c.bf16 %v6095_v28, %v3134_v11 }
 0x4bc   : > { %5441 = vst [vmem:[%s7622_s11 + $0x58] sm:$0xff] %v5166_v56   ;;  %v6098_v18 = vpop.f32.mrb[48].mxu0 }
 0x4bd   : > { %v3144_v2 = vpop.f32.mrb[49].mxu0 }
 0x4be   : > { %v5171_v7 = vpack.c.bf16 %v6098_v18, %v3144_v2 }
 0x4c0   : > { %5442 = vst [vmem:[%s7622_s11 + $0x60] sm:$0xff] %v5171_v7   ;;  %v6101_v12 = vpop.f32.mrb[50].mxu0 }
 0x4c1   : > { %v3154_v40 = vpop.f32.mrb[51].mxu0 }
 0x4c2   : > { %v5176_v52 = vpack.c.bf16 %v6101_v12, %v3154_v40 }
 0x4c4   : > { %5443 = vst [vmem:[%s7622_s11 + $0x68] sm:$0xff] %v5176_v52   ;;  %v6104_v45 = vpop.f32.mrb[52].mxu0 }
 0x4c5   : > { %v3164_v51 = vpop.f32.mrb[53].mxu0 }
 0x4c6   : > { %v5181_v38 = vpack.c.bf16 %v6104_v45, %v3164_v51 }
 0x4c8   : > { %5444 = vst [vmem:[%s7622_s11 + $0x70] sm:$0xff] %v5181_v38   ;;  %v6107_v48 = vpop.f32.mrb[54].mxu0 }
 0x4c9   : > { %v3174_v20 = vpop.f32.mrb[55].mxu0 }
 0x4ca   : > { %v5186_v57 = vpack.c.bf16 %v6107_v48, %v3174_v20 }
 0x4cc   : > { %5445 = vst [vmem:[%s7622_s11 + $0x78] sm:$0xff] %v5186_v57   ;;  %v6110_v25 = vpop.f32.mrb[56].mxu0 }
 0x4cd   : > { %v3184_v27 = vpop.f32.mrb[57].mxu0 }
 0x4ce   : > { %v5191_v8 = vpack.c.bf16 %v6110_v25, %v3184_v27 }
 0x4d0   : > { %5446 = vst [vmem:[%s7622_s11 + $0x80] sm:$0xff] %v5191_v8   ;;  %v6113_v46 = vpop.f32.mrb[58].mxu0 }
 0x4d1   : > { %v3194_v61 = vpop.f32.mrb[59].mxu0 }
 0x4d2   : > { %v5196_v43 = vpack.c.bf16 %v6113_v46, %v3194_v61 }
 0x4d4   : > { %5447 = vst [vmem:[%s7622_s11 + $0x88] sm:$0xff] %v5196_v43   ;;  %v6116_v39 = vpop.f32.mrb[60].mxu0 }
 0x4d5   : > { %v3204_v1 = vpop.f32.mrb[61].mxu0 }
 0x4d6   : > { %v5201_v4 = vpack.c.bf16 %v6116_v39, %v3204_v1 }
 0x4d8   : > { %5448 = vst [vmem:[%s7622_s11 + $0x90] sm:$0xff] %v5201_v4   ;;  %v6119_v16 = vpop.f32.mrb[62].mxu0 }
 0x4d9   : > { %v3214_v47 = vpop.f32.mrb[63].mxu0 }
 0x4da   : > { %v5206_v19 = vpack.c.bf16 %v6119_v16, %v3214_v47 }
 0x4dc   : > { %5449 = vst [vmem:[%s7622_s11 + $0x98] sm:$0xff] %v5206_v19   ;;  %v6122_v37 = vpop.f32.mrb[64].mxu0 }
 0x4dd   : > { %v3224_v35 = vpop.f32.mrb[65].mxu0 }
 0x4de   : > { %v5211_v21 = vpack.c.bf16 %v6122_v37, %v3224_v35 }
 0x4e0   : > { %5450 = vst [vmem:[%s7622_s11 + $0xa0] sm:$0xff] %v5211_v21   ;;  %v6125_v23 = vpop.f32.mrb[66].mxu0 }
 0x4e1   : > { %v3234_v41 = vpop.f32.mrb[67].mxu0 }
 0x4e2   : > { %v5216_v26 = vpack.c.bf16 %v6125_v23, %v3234_v41 }
 0x4e4   : > { %5451 = vst [vmem:[%s7622_s11 + $0xa8] sm:$0xff] %v5216_v26   ;;  %v6128_v0 = vpop.f32.mrb[68].mxu0 }
 0x4e5   : > { %v3244_v54 = vpop.f32.mrb[69].mxu0 }
 0x4e6   : > { %v5221_v6 = vpack.c.bf16 %v6128_v0, %v3244_v54 }
 0x4e8   : > { %5452 = vst [vmem:[%s7622_s11 + $0xb0] sm:$0xff] %v5221_v6   ;;  %v6131_v49 = vpop.f32.mrb[70].mxu0 }
 0x4e9   : > { %v3254_v42 = vpop.f32.mrb[71].mxu0 }
 0x4ea   : > { %v5226_v58 = vpack.c.bf16 %v6131_v49, %v3254_v42 }
 0x4ec   : > { %5453 = vst [vmem:[%s7622_s11 + $0xb8] sm:$0xff] %v5226_v58   ;;  %v6134_v9 = vpop.f32.mrb[72].mxu0 }
 0x4ed   : > { %v3264_v15 = vpop.f32.mrb[73].mxu0 }
 0x4ee   : > { %v5231_v22 = vpack.c.bf16 %v6134_v9, %v3264_v15 }
 0x4f0   : > { %5454 = vst [vmem:[%s7622_s11 + $0xc0] sm:$0xff] %v5231_v22   ;;  %v6137_v44 = vpop.f32.mrb[74].mxu0 }
 0x4f1   : > { %v3274_v33 = vpop.f32.mrb[75].mxu0 }
 0x4f2   : > { %v5236_v34 = vpack.c.bf16 %v6137_v44, %v3274_v33 }
 0x4f4   : > { %5455 = vst [vmem:[%s7622_s11 + $0xc8] sm:$0xff] %v5236_v34   ;;  %v6140_v29 = vpop.f32.mrb[76].mxu0 }
 0x4f5   : > { %v3284_v36 = vpop.f32.mrb[77].mxu0 }
 0x4f6   : > { %v5241_v50 = vpack.c.bf16 %v6140_v29, %v3284_v36 }
 0x4f8   : > { %5456 = vst [vmem:[%s7622_s11 + $0xd0] sm:$0xff] %v5241_v50   ;;  %v6143_v14 = vpop.f32.mrb[78].mxu0 }
 0x4f9   : > { %v3294_v55 = vpop.f32.mrb[79].mxu0 }
 0x4fa   : > { %v5246_v59 = vpack.c.bf16 %v6143_v14, %v3294_v55 }
 0x4fc   : > { %5457 = vst [vmem:[%s7622_s11 + $0xd8] sm:$0xff] %v5246_v59   ;;  %v6146_v60 = vpop.f32.mrb[80].mxu0 }
 0x4fd   : > { %v3304_v63 = vpop.f32.mrb[81].mxu0 }
 0x4fe   : > { %v5251_v62 = vpack.c.bf16 %v6146_v60, %v3304_v63 }
 0x500   : > { %5458 = vst [vmem:[%s7622_s11 + $0xe0] sm:$0xff] %v5251_v62   ;;  %v6149_v3 = vpop.f32.mrb[82].mxu0 }
 0x501   : > { %v3314_v5 = vpop.f32.mrb[83].mxu0 }
 0x502   : > { %v5256_v10 = vpack.c.bf16 %v6149_v3, %v3314_v5 }
 0x504   : > { %5459 = vst [vmem:[%s7622_s11 + $0xe8] sm:$0xff] %v5256_v10   ;;  %v6152_v13 = vpop.f32.mrb[84].mxu0 }
 0x505   : > { %v3324_v17 = vpop.f32.mrb[85].mxu0 }
 0x506   : > { %v5261_v53 = vpack.c.bf16 %v6152_v13, %v3324_v17 }
 0x508   : > { %5460 = vst [vmem:[%s7622_s11 + $0xf0] sm:$0xff] %v5261_v53   ;;  %v6155_v32 = vpop.f32.mrb[86].mxu0 }
 0x509   : > { %v3334_v24 = vpop.f32.mrb[87].mxu0 }
 0x50a   : > { %v5266_v30 = vpack.c.bf16 %v6155_v32, %v3334_v24 }
 0x50c   : > { %5461 = vst [vmem:[%s7622_s11 + $0xf8] sm:$0xff] %v5266_v30   ;;  %v6158_v31 = vpop.f32.mrb[88].mxu0 }
 0x50d   : > { %v3344_v28 = vpop.f32.mrb[89].mxu0 }
 0x50e   : > { %v5271_v11 = vpack.c.bf16 %v6158_v31, %v3344_v28 }
 0x510   : > { %5462 = vst [vmem:[%s7622_s11 + $0x100] sm:$0xff] %v5271_v11   ;;  %v6161_v56 = vpop.f32.mrb[90].mxu0 }
 0x511   : > { %v3354_v18 = vpop.f32.mrb[91].mxu0 }
 0x512   : > { %v5276_v2 = vpack.c.bf16 %v6161_v56, %v3354_v18 }
 0x514   : > { %5463 = vst [vmem:[%s7622_s11 + $0x108] sm:$0xff] %v5276_v2   ;;  %v6164_v7 = vpop.f32.mrb[92].mxu0 }
 0x515   : > { %v3364_v12 = vpop.f32.mrb[93].mxu0 }
 0x516   : > { %v5281_v40 = vpack.c.bf16 %v6164_v7, %v3364_v12 }
 0x518   : > { %5464 = vst [vmem:[%s7622_s11 + $0x110] sm:$0xff] %v5281_v40   ;;  %v6167_v52 = vpop.f32.mrb[94].mxu0 }
 0x519   : > { %v3374_v45 = vpop.f32.mrb[95].mxu0 }
 0x51a   : > { %v5286_v51 = vpack.c.bf16 %v6167_v52, %v3374_v45 }
 0x51c   : > { %5465 = vst [vmem:[%s7622_s11 + $0x118] sm:$0xff] %v5286_v51   ;;  %v6170_v38 = vpop.f32.mrb[96].mxu0 }
 0x51d   : > { %v3384_v48 = vpop.f32.mrb[97].mxu0 }
 0x51e   : > { %v5291_v20 = vpack.c.bf16 %v6170_v38, %v3384_v48 }
 0x520   : > { %5466 = vst [vmem:[%s7622_s11 + $0x120] sm:$0xff] %v5291_v20   ;;  %v6173_v57 = vpop.f32.mrb[98].mxu0 }
 0x521   : > { %v3394_v25 = vpop.f32.mrb[99].mxu0 }
 0x522   : > { %v5296_v27 = vpack.c.bf16 %v6173_v57, %v3394_v25 }
 0x524   : > { %5467 = vst [vmem:[%s7622_s11 + $0x128] sm:$0xff] %v5296_v27   ;;  %v6176_v8 = vpop.f32.mrb[100].mxu0 }
 0x525   : > { %v3404_v46 = vpop.f32.mrb[101].mxu0 }
 0x526   : > { %v5301_v61 = vpack.c.bf16 %v6176_v8, %v3404_v46 }
 0x528   : > { %5468 = vst [vmem:[%s7622_s11 + $0x130] sm:$0xff] %v5301_v61   ;;  %v6179_v43 = vpop.f32.mrb[102].mxu0 }
 0x529   : > { %v3414_v39 = vpop.f32.mrb[103].mxu0 }
 0x52a   : > { %v5306_v1 = vpack.c.bf16 %v6179_v43, %v3414_v39 }
 0x52c   : > { %5469 = vst [vmem:[%s7622_s11 + $0x138] sm:$0xff] %v5306_v1   ;;  %v6182_v4 = vpop.f32.mrb[104].mxu0 }
 0x52d   : > { %v3424_v16 = vpop.f32.mrb[105].mxu0 }
 0x52e   : > { %v5311_v47 = vpack.c.bf16 %v6182_v4, %v3424_v16 }
 0x530   : > { %5470 = vst [vmem:[%s7622_s11 + $0x140] sm:$0xff] %v5311_v47   ;;  %v6185_v19 = vpop.f32.mrb[106].mxu0 }
 0x531   : > { %v3434_v37 = vpop.f32.mrb[107].mxu0 }
 0x532   : > { %v5316_v35 = vpack.c.bf16 %v6185_v19, %v3434_v37 }
 0x534   : > { %5471 = vst [vmem:[%s7622_s11 + $0x148] sm:$0xff] %v5316_v35   ;;  %v6188_v21 = vpop.f32.mrb[108].mxu0 }
 0x535   : > { %v3444_v23 = vpop.f32.mrb[109].mxu0 }
 0x536   : > { %v5321_v41 = vpack.c.bf16 %v6188_v21, %v3444_v23 }
 0x538   : > { %5472 = vst [vmem:[%s7622_s11 + $0x150] sm:$0xff] %v5321_v41   ;;  %v6191_v26 = vpop.f32.mrb[110].mxu0 }
 0x539   : > { %v3454_v0 = vpop.f32.mrb[111].mxu0 }
 0x53a   : > { %v5326_v54 = vpack.c.bf16 %v6191_v26, %v3454_v0 }
 0x53c   : > { %5473 = vst [vmem:[%s7622_s11 + $0x158] sm:$0xff] %v5326_v54   ;;  %v6194_v6 = vpop.f32.mrb[112].mxu0 }
 0x53d   : > { %v3464_v49 = vpop.f32.mrb[113].mxu0 }
 0x53e   : > { %v5331_v42 = vpack.c.bf16 %v6194_v6, %v3464_v49 }
 0x540   : > { %5474 = vst [vmem:[%s7622_s11 + $0x160] sm:$0xff] %v5331_v42   ;;  %v6197_v58 = vpop.f32.mrb[114].mxu0 }
 0x541   : > { %v3474_v9 = vpop.f32.mrb[115].mxu0 }
 0x542   : > { %v5336_v15 = vpack.c.bf16 %v6197_v58, %v3474_v9 }
 0x544   : > { %5475 = vst [vmem:[%s7622_s11 + $0x168] sm:$0xff] %v5336_v15   ;;  %v6200_v22 = vpop.f32.mrb[116].mxu0 }
 0x545   : > { %v3484_v44 = vpop.f32.mrb[117].mxu0 }
 0x546   : > { %v5341_v33 = vpack.c.bf16 %v6200_v22, %v3484_v44 }
 0x548   : > { %5476 = vst [vmem:[%s7622_s11 + $0x170] sm:$0xff] %v5341_v33   ;;  %v6203_v34 = vpop.f32.mrb[118].mxu0 }
 0x549   : > { %v3494_v29 = vpop.f32.mrb[119].mxu0 }
 0x54a   : > { %v5346_v36 = vpack.c.bf16 %v6203_v34, %v3494_v29 }
 0x54c   : > { %5477 = vst [vmem:[%s7622_s11 + $0x178] sm:$0xff] %v5346_v36   ;;  %v6206_v50 = vpop.f32.mrb[120].mxu0 }
 0x54d   : > { %v3504_v14 = vpop.f32.mrb[121].mxu0 }
 0x54e   : > { %v5351_v55 = vpack.c.bf16 %v6206_v50, %v3504_v14 }
 0x550   : > { %5478 = vst [vmem:[%s7622_s11 + $0x180] sm:$0xff] %v5351_v55   ;;  %v6209_v59 = vpop.f32.mrb[122].mxu0 }
 0x551   : > { %v3514_v60 = vpop.f32.mrb[123].mxu0 }
 0x552   : > { %v5356_v63 = vpack.c.bf16 %v6209_v59, %v3514_v60 }
 0x554   : > { %5479 = vst [vmem:[%s7622_s11 + $0x188] sm:$0xff] %v5356_v63   ;;  %v6212_v62 = vpop.f32.mrb[124].mxu0 }
 0x555   : > { %v3524_v3 = vpop.f32.mrb[125].mxu0 }
 0x556   : > { %v5361_v5 = vpack.c.bf16 %v6212_v62, %v3524_v3 }
 0x558   : > { %5480 = vst [vmem:[%s7622_s11 + $0x190] sm:$0xff] %v5361_v5   ;;  %v6215_v10 = vpop.f32.mrb[126].mxu0 }
 0x559   : > { %v3534_v13 = vpop.f32.mrb[127].mxu0 }
 0x55a   : > { %v5366_v17 = vpack.c.bf16 %v6215_v10, %v3534_v13 }
 0x55c   : > { %5481 = vst [vmem:[%s7622_s11 + $0x198] sm:$0xff] %v5366_v17   ;;  %v6218_v53 = vpop.f32.mrb[128].mxu0 }
 0x55d   : > { %v3544_v32 = vpop.f32.mrb[129].mxu0 }
 0x55e   : > { %v5371_v24 = vpack.c.bf16 %v6218_v53, %v3544_v32 }
 0x560   : > { %5482 = vst [vmem:[%s7622_s11 + $0x1a0] sm:$0xff] %v5371_v24   ;;  %v6221_v30 = vpop.f32.mrb[130].mxu0 }
 0x561   : > { %v3554_v31 = vpop.f32.mrb[131].mxu0 }
 0x562   : > { %v5376_v28 = vpack.c.bf16 %v6221_v30, %v3554_v31 }
 0x564   : > { %5483 = vst [vmem:[%s7622_s11 + $0x1a8] sm:$0xff] %v5376_v28   ;;  %v6224_v11 = vpop.f32.mrb[132].mxu0 }
 0x565   : > { %v3564_v56 = vpop.f32.mrb[133].mxu0 }
 0x566   : > { %v5381_v18 = vpack.c.bf16 %v6224_v11, %v3564_v56 }
 0x568   : > { %5484 = vst [vmem:[%s7622_s11 + $0x1b0] sm:$0xff] %v5381_v18   ;;  %v6227_v2 = vpop.f32.mrb[134].mxu0 }
 0x569   : > { %v3574_v7 = vpop.f32.mrb[135].mxu0 }
 0x56a   : > { %v5386_v12 = vpack.c.bf16 %v6227_v2, %v3574_v7 }
 0x56c   : > { %5485 = vst [vmem:[%s7622_s11 + $0x1b8] sm:$0xff] %v5386_v12   ;;  %v6230_v40 = vpop.f32.mrb[136].mxu0 }
 0x56d   : > { %v3584_v52 = vpop.f32.mrb[137].mxu0 }
 0x56e   : > { %v5391_v45 = vpack.c.bf16 %v6230_v40, %v3584_v52 }
 0x570   : > { %5486 = vst [vmem:[%s7622_s11 + $0x1c0] sm:$0xff] %v5391_v45   ;;  %v6233_v51 = vpop.f32.mrb[138].mxu0 }
 0x571   : > { %v3594_v38 = vpop.f32.mrb[139].mxu0 }
 0x572   : > { %v5396_v48 = vpack.c.bf16 %v6233_v51, %v3594_v38 }
 0x574   : > { %5487 = vst [vmem:[%s7622_s11 + $0x1c8] sm:$0xff] %v5396_v48   ;;  %v6236_v20 = vpop.f32.mrb[140].mxu0 }
 0x575   : > { %v3604_v57 = vpop.f32.mrb[141].mxu0 }
 0x576   : > { %v5401_v25 = vpack.c.bf16 %v6236_v20, %v3604_v57 }
 0x578   : > { %5488 = vst [vmem:[%s7622_s11 + $0x1d0] sm:$0xff] %v5401_v25   ;;  %v6239_v27 = vpop.f32.mrb[142].mxu0 }
 0x579   : > { %v3614_v8 = vpop.f32.mrb[143].mxu0 }
 0x57a   : > { %v5406_v46 = vpack.c.bf16 %v6239_v27, %v3614_v8 }
 0x57c   : > { %5489 = vst [vmem:[%s7622_s11 + $0x1d8] sm:$0xff] %v5406_v46   ;;  %v6242_v61 = vpop.f32.mrb[144].mxu0 }
 0x57d   : > { %v3624_v43 = vpop.f32.mrb[145].mxu0 }
 0x57e   : > { %v5411_v39 = vpack.c.bf16 %v6242_v61, %v3624_v43 }
 0x580   : > { %5490 = vst [vmem:[%s7622_s11 + $0x1e0] sm:$0xff] %v5411_v39   ;;  %v6245_v1 = vpop.f32.mrb[146].mxu0 }
 0x581   : > { %v3634_v4 = vpop.f32.mrb[147].mxu0 }
 0x582   : > { %v5416_v16 = vpack.c.bf16 %v6245_v1, %v3634_v4 }
 0x584   : > { %5491 = vst [vmem:[%s7622_s11 + $0x1e8] sm:$0xff] %v5416_v16   ;;  %v6248_v47 = vpop.f32.mrb[148].mxu0 }
 0x585   : > { %v3644_v19 = vpop.f32.mrb[149].mxu0 }
 0x586   : > { %v5421_v37 = vpack.c.bf16 %v6248_v47, %v3644_v19 }
 0x588   : > { %5492 = vst [vmem:[%s7622_s11 + $0x1f0] sm:$0xff] %v5421_v37   ;;  %v6251_v35 = vpop.f32.mrb[150].mxu0 }
 0x589   : > { %v3654_v21 = vpop.f32.mrb[151].mxu0 }
 0x58a   : > { %v5426_v23 = vpack.c.bf16 %v6251_v35, %v3654_v21 }
 0x58c   : > { %5493 = vst [vmem:[%s7622_s11 + $0x1f8] sm:$0xff] %v5426_v23  }
 0x58d PF: > { %s20_s30 = sadd.s32 1, %s6450_s30  }
 0x58e   : > { %p17_p4 = scmp.ge.s32.totalorder %s20_s30, 4  }
 0x590   :  { %19 = sbr.rel (!%p17_p4) target bundleno = 1 (0x1), region = 105 }

</bundles_post_ra>
